<compile_context>
chip_gen: v7x
topology: tpu7x:2x2x1
jax: 0.10.0
libtpu: 0.0.40
codegen_flags: <defaults>
</compile_context>

<pallas_src>
import functools

import jax
import jax.numpy as jnp
from jax.experimental import pallas as pl
from jax.experimental.pallas import tpu as pltpu

HIDDEN = 20                        # logical hidden width of the PyTorch module
HP = 32                            # padded hidden width (padding is exact zeros)
OUT_W = 4 * HP                     # packed output: [o1 | o2 | o3 | logits] = 128 lanes
BN_EPS = 1e-5
VMEM_LIMIT = 48 * 1024 * 1024      # <= v7x's 64 MiB physical, leaves headroom
MAX_CHUNKS = 32                    # cap on the in-kernel K-chunk unroll
A_BUF_BUDGET = 24 * 1024 * 1024    # budget for A's double-buffered block


# ----------------------------------------------------------------------------
# Kernels
# ----------------------------------------------------------------------------
def _gin_mlp(agg, wa, ba, wb, bb):
    # nn.Sequential(Linear, ReLU, Linear, ReLU) of one GINConv.
    h = jnp.maximum(jnp.dot(agg, wa, preferred_element_type=jnp.float32) + ba, 0.0)
    return jnp.maximum(jnp.dot(h, wb, preferred_element_type=jnp.float32) + bb, 0.0)


def _accumulate_agg(a_ref, r_ref, rs, rb, acc_ref, k, *, tm, tk):
    """acc += A[row tile, k-th column block] @ affine(prev)[k-th row block].

    The bf16 A block is widened one (tm, tm) chunk at a time, so the f32 temp
    is bounded by tm^2*4 bytes (never tm*n_pad*4).  tk is a multiple of tm and
    tk // tm <= MAX_CHUNKS, so this is a short static unroll.
    """
    acc = acc_ref[...]
    for c in range(tk // tm):
        a_chunk = a_ref[:, c * tm:(c + 1) * tm].astype(jnp.float32)   # exact {0,1}
        row0 = pl.multiple_of(k * tk + c * tm, tm)
        r_chunk = r_ref[pl.ds(row0, tm), :] * rs + rb                 # BN affine of prev layer
        acc = acc + jnp.dot(a_chunk, r_chunk, preferred_element_type=jnp.float32)
    acc_ref[...] = acc


def gin_stage_kernel(a_ref, r_ref, rs_ref, rb_ref,
                     wa_ref, ba_ref, wb_ref, bb_ref,
                     h_ref, stats_ref, acc_ref,
                     *, tm, tk, n_k, n_real):
    i = pl.program_id(0)           # node row tile  (megacore-parallel)
    k = pl.program_id(1)           # A column block (reduction, arbitrary)

    @pl.when(k == 0)
    def _():
        acc_ref[...] = jnp.zeros_like(acc_ref)

    _accumulate_agg(a_ref, r_ref, rs_ref[...], rb_ref[...], acc_ref, k, tm=tm, tk=tk)

    @pl.when(k == n_k - 1)
    def _():
        h = _gin_mlp(acc_ref[...], wa_ref[...], ba_ref[...], wb_ref[...], bb_ref[...])
        h_ref[...] = h             # pre-BN activations for this row tile
        # Per-tile BatchNorm partial sums over REAL nodes only, reduced on the
        # MXU (ones-mask [1,tm] @ h).  The cross-tile reduction happens outside
        # the kernel so the row-tile axis can stay parallel.
        ids = jax.lax.broadcasted_iota(jnp.int32, (1, tm), 1) + i * tm
        mask = (ids < n_real).astype(jnp.float32)
        stats_ref[:, 0, :] = jnp.dot(mask, h, preferred_element_type=jnp.float32)
        stats_ref[:, 1, :] = jnp.dot(mask, h * h, preferred_element_type=jnp.float32)


def gin_head_kernel(a_ref, r_ref, rs_ref, rb_ref,
                    h1_ref, s1_ref, b1_ref, h2_ref,
                    w3a_ref, b3a_ref, w3b_ref, b3b_ref,
                    wl1_ref, wl2_ref, wl3_ref, bl_ref,
                    out_ref, acc_ref,
                    *, tm, tk, n_k):
    k = pl.program_id(1)

    @pl.when(k == 0)
    def _():
        acc_ref[...] = jnp.zeros_like(acc_ref)

    _accumulate_agg(a_ref, r_ref, rs_ref[...], rb_ref[...], acc_ref, k, tm=tm, tk=tk)

    @pl.when(k == n_k - 1)
    def _():
        o3 = _gin_mlp(acc_ref[...], w3a_ref[...], b3a_ref[...],
                      w3b_ref[...], b3b_ref[...])
        o1 = h1_ref[...] * s1_ref[...] + b1_ref[...]     # BN1(h1) rows of this tile
        o2 = h2_ref[...] * rs_ref[...] + rb_ref[...]     # BN2(h2) rows of this tile
        # Packed, lane-dense (tm, 128) output block: embedding + padded logits.
        out_ref[:, 0 * HP:1 * HP] = o1
        out_ref[:, 1 * HP:2 * HP] = o2
        out_ref[:, 2 * HP:3 * HP] = o3
        # Head: concat([o1,o2,o3]) @ Wl + b  ==  o1@Wl1 + o2@Wl2 + o3@Wl3 + b.
        out_ref[:, 3 * HP:4 * HP] = (
            jnp.dot(o1, wl1_ref[...], preferred_element_type=jnp.float32)
            + jnp.dot(o2, wl2_ref[...], preferred_element_type=jnp.float32)
            + jnp.dot(o3, wl3_ref[...], preferred_element_type=jnp.float32)
            + bl_ref[...])


# ----------------------------------------------------------------------------
# Wrappers
# ----------------------------------------------------------------------------
def _resident(arr):
    # Small arrays: block == full array, constant index -> fetched once,
    # VMEM-resident across the whole grid.
    return pl.BlockSpec(arr.shape, lambda i, k: (0, 0))


def _choose_k_split(n_tiles, tm):
    """Pick n_k (number of A column blocks).  tk = n_pad / n_k must be a
    multiple of tm, so n_k must divide n_tiles.  Prefer the fattest block
    (n_k = 1, best per-step overhead amortization) that keeps A's double
    buffer under budget and the in-kernel chunk unroll bounded."""
    for d in range(1, n_tiles + 1):
        if n_tiles % d:
            continue
        tk = (n_tiles // d) * tm
        if tk // tm <= MAX_CHUNKS and 2 * (tm * tk * 2) <= A_BUF_BUDGET:
            return d, tk
    return n_tiles, tm


def _compiler_params():
    return pltpu.CompilerParams(
        dimension_semantics=("parallel", "arbitrary"),
        vmem_limit_bytes=VMEM_LIMIT)


def _gin_stage(a_p, rhs, rs, rb, wa, ba, wb, bb, *, tm, tk, n_k, n_tiles, n_real):
    n_pad = n_tiles * tm
    kernel = functools.partial(gin_stage_kernel, tm=tm, tk=tk, n_k=n_k, n_real=n_real)
    return pl.pallas_call(
        kernel,
        grid=(n_tiles, n_k),
        in_specs=[
            pl.BlockSpec((tm, tk), lambda i, k: (i, k)),        # A: streamed (bf16)
            _resident(rhs), _resident(rs), _resident(rb),        # prev acts + BN affine
            _resident(wa), _resident(ba), _resident(wb), _resident(bb),
        ],
        out_specs=[
            pl.BlockSpec((tm, HP), lambda i, k: (i, 0)),         # pre-BN h
            pl.BlockSpec((1, 2, HP), lambda i, k: (i, 0, 0)),    # per-tile BN partials
        ],
        out_shape=[
            jax.ShapeDtypeStruct((n_pad, HP), jnp.float32),
            jax.ShapeDtypeStruct((n_tiles, 2, HP), jnp.float32),
        ],
        scratch_shapes=[pltpu.VMEM((tm, rhs.shape[1]), jnp.float32)],
        compiler_params=_compiler_params(),
    )(a_p, rhs, rs, rb, wa, ba, wb, bb)


def _gin_head(a_p, h2, sc2, sh2, h1, sc1, sh1, w3a, b3a, w3b, b3b,
              wl1, wl2, wl3, bl, *, tm, tk, n_k, n_tiles):
    n_pad = n_tiles * tm
    kernel = functools.partial(gin_head_kernel, tm=tm, tk=tk, n_k=n_k)
    row_tile = pl.BlockSpec((tm, HP), lambda i, k: (i, 0))
    return pl.pallas_call(
        kernel,
        grid=(n_tiles, n_k),
        in_specs=[
            pl.BlockSpec((tm, tk), lambda i, k: (i, k)),        # A: streamed (bf16)
            _resident(h2), _resident(sc2), _resident(sh2),       # agg RHS = BN2(h2)
            row_tile, _resident(sc1), _resident(sh1),            # h1 tile + BN1 affine
            row_tile,                                            # h2 tile (for head/emb)
            _resident(w3a), _resident(b3a), _resident(w3b), _resident(b3b),
            _resident(wl1), _resident(wl2), _resident(wl3), _resident(bl),
        ],
        out_specs=pl.BlockSpec((tm, OUT_W), lambda i, k: (i, 0)),
        out_shape=jax.ShapeDtypeStruct((n_pad, OUT_W), jnp.float32),
        scratch_shapes=[pltpu.VMEM((tm, HP), jnp.float32)],
        compiler_params=_compiler_params(),
    )(a_p, h2, sc2, sh2, h1, sc1, sh1, h2, w3a, b3a, w3b, b3b, wl1, wl2, wl3, bl)


def _bn_affine(stats, gamma, beta, n_real):
    # Training-mode BatchNorm1d over all real nodes (biased variance), reduced
    # from the per-tile MXU partial sums.  NOTE: one-pass E[x^2]-E[x]^2 in f32.
    s = jnp.sum(stats, axis=0)                     # (2, HP): [sum(h), sum(h*h)]
    mu = s[0] / n_real
    var = s[1] / n_real - mu * mu
    scale = gamma[0] * jax.lax.rsqrt(var + BN_EPS)
    shift = beta[0] - mu * scale
    return scale[None, :], shift[None, :]


def _pad2(a, shape, fill=0.0):
    out = jnp.full(shape, fill, a.dtype)
    return out.at[:a.shape[0], :a.shape[1]].set(a)


def node_gin_forward(a_hat, x, params, num_classes, *, tm=256):
    assert num_classes <= HP, "packed head output assumes num_classes <= 32"
    N, F = x.shape
    n_tiles = -(-N // tm)
    n_pad = n_tiles * tm
    n_k, tk = _choose_k_split(n_tiles, tm)

    # --- layout / dtype prep (all padding is exact zeros -> lossless) --------
    # A_hat values are exactly {0, 1+eps} with eps=0 -> bf16 storage is exact
    # and halves A's HBM traffic (A dominates: streamed 3x at n_pad^2 bytes).
    a_p = _pad2(a_hat, (n_pad, n_pad)).astype(jnp.bfloat16)
    x_p = _pad2(x.astype(jnp.float32), (n_pad, F))

    P = params
    w1a = _pad2(P["w1a_t"], (F, HP));        b1a = _pad2(P["b1a"], (1, HP))
    w1b = _pad2(P["w1b_t"], (HP, HP));       b1b = _pad2(P["b1b"], (1, HP))
    g1 = _pad2(P["g1"], (1, HP), fill=1.0);  be1 = _pad2(P["be1"], (1, HP))
    w2a = _pad2(P["w2a_t"], (HP, HP));       b2a = _pad2(P["b2a"], (1, HP))
    w2b = _pad2(P["w2b_t"], (HP, HP));       b2b = _pad2(P["b2b"], (1, HP))
    g2 = _pad2(P["g2"], (1, HP), fill=1.0);  be2 = _pad2(P["be2"], (1, HP))
    w3a = _pad2(P["w3a_t"], (HP, HP));       b3a = _pad2(P["b3a"], (1, HP))
    w3b = _pad2(P["w3b_t"], (HP, HP));       b3b = _pad2(P["b3b"], (1, HP))
    wl = P["wl_t"]                                   # [3*HIDDEN, C]
    wl1 = _pad2(wl[0 * HIDDEN:1 * HIDDEN], (HP, HP))
    wl2 = _pad2(wl[1 * HIDDEN:2 * HIDDEN], (HP, HP))
    wl3 = _pad2(wl[2 * HIDDEN:3 * HIDDEN], (HP, HP))
    bl = _pad2(P["bl"], (1, HP))

    ones_f = jnp.ones((1, F), jnp.float32)
    zeros_f = jnp.zeros((1, F), jnp.float32)
    common = dict(tm=tm, tk=tk, n_k=n_k, n_tiles=n_tiles)

    # conv1 (+ per-tile BN1 partial sums)
    h1, st1 = _gin_stage(a_p, x_p, ones_f, zeros_f, w1a, b1a, w1b, b1b,
                         n_real=N, **common)
    sc1, sh1 = _bn_affine(st1, g1, be1, N)
    # conv2 (BN1 affine folded into the RHS reads) (+ per-tile BN2 partials)
    h2, st2 = _gin_stage(a_p, h1, sc1, sh1, w2a, b2a, w2b, b2b,
                         n_real=N, **common)
    sc2, sh2 = _bn_affine(st2, g2, be2, N)
    # conv3 + classifier head, packed lane-dense (n_pad, 128) output
    packed = _gin_head(a_p, h2, sc2, sh2, h1, sc1, sh1, w3a, b3a, w3b, b3b,
                       wl1, wl2, wl3, bl, **common)

    out = packed[:N, 3 * HP:3 * HP + num_classes]
    emb = jnp.concatenate(
        [packed[:N, 0 * HP:0 * HP + HIDDEN],
         packed[:N, 1 * HP:1 * HP + HIDDEN],
         packed[:N, 2 * HP:2 * HP + HIDDEN]], axis=1)
    return out, emb


# ----------------------------------------------------------------------------
# Pure-JAX reference (same math as the PyTorch module) + test harness
# ----------------------------------------------------------------------------
def reference_forward(a_hat, x, params):
    def mlp(agg, wa_t, ba, wb_t, bb):
        h = jnp.maximum(agg @ wa_t + ba, 0.0)
        return jnp.maximum(h @ wb_t + bb, 0.0)

    def bn(h, g, b):
        mu = jnp.mean(h, axis=0, keepdims=True)
        var = jnp.mean((h - mu) ** 2, axis=0, keepdims=True)
        return (h - mu) / jnp.sqrt(var + BN_EPS) * g + b

    o1 = bn(mlp(a_hat @ x, params["w1a_t"], params["b1a"],
                params["w1b_t"], params["b1b"]),
            params["g1"], params["be1"])
    o2 = bn(mlp(a_hat @ o1, params["w2a_t"], params["b2a"],
                params["w2b_t"], params["b2b"]),
            params["g2"], params["be2"])
    o3 = mlp(a_hat @ o2, params["w3a_t"], params["b3a"],
             params["w3b_t"], params["b3b"])
    emb = jnp.concatenate([o1, o2, o3], axis=1)
    return emb @ params["wl_t"] + params["bl"], emb


def make_params(key, num_features, num_classes):
    keys = jax.random.split(key, 16)
    sd = 0.1

    def w(k, shape):
        return (sd * jax.random.normal(k, shape)).astype(jnp.float32)

    return {
        # conv1 MLP: Linear(F, 20) -> ReLU -> Linear(20, 20) -> ReLU
        "w1a_t": w(keys[0], (num_features, HIDDEN)), "b1a": w(keys[1], (1, HIDDEN)),
        "w1b_t": w(keys[2], (HIDDEN, HIDDEN)),       "b1b": w(keys[3], (1, HIDDEN)),
        "g1": jnp.ones((1, HIDDEN), jnp.float32),    "be1": jnp.zeros((1, HIDDEN), jnp.float32),
        # conv2 MLP
        "w2a_t": w(keys[4], (HIDDEN, HIDDEN)),       "b2a": w(keys[5], (1, HIDDEN)),
        "w2b_t": w(keys[6], (HIDDEN, HIDDEN)),       "b2b": w(keys[7], (1, HIDDEN)),
        "g2": jnp.ones((1, HIDDEN), jnp.float32),    "be2": jnp.zeros((1, HIDDEN), jnp.float32),
        # conv3 MLP
        "w3a_t": w(keys[8], (HIDDEN, HIDDEN)),       "b3a": w(keys[9], (1, HIDDEN)),
        "w3b_t": w(keys[10], (HIDDEN, HIDDEN)),      "b3b": w(keys[11], (1, HIDDEN)),
        # final Linear(60, num_classes)
        "wl_t": w(keys[12], (3 * HIDDEN, num_classes)), "bl": w(keys[13], (1, num_classes)),
    }


def build_adjacency(edge_index, num_nodes, eps=0.0):
    # GINConv_mask with edge_weights=None: remove self loops, add self loops,
    # weight 1.0 everywhere (added self loops get 1.0 + eps, eps = 0).
    src, dst = edge_index[0], edge_index[1]
    wts = jnp.where(src != dst, 1.0, 0.0)
    a = jnp.zeros((num_nodes, num_nodes), jnp.float32).at[dst, src].add(wts)
    return a + (1.0 + eps) * jnp.eye(num_nodes, dtype=jnp.float32)


if __name__ == "__main__":
    num_nodes = 300        # NOT a multiple of the row tile -> exercises masking
    num_features = 10
    num_classes = 4

    key = jax.random.PRNGKey(0)
    k_x, k_p = jax.random.split(key)
    x = jax.random.normal(k_x, (num_nodes, num_features), jnp.float32)

    # Deterministic graph: bidirectional ring + bidirectional (+5) chords.
    idx = jnp.arange(num_nodes)
    src = jnp.concatenate([idx, (idx + 1) % num_nodes, idx, (idx + 5) % num_nodes])
    dst = jnp.concatenate([(idx + 1) % num_nodes, idx, (idx + 5) % num_nodes, idx])
    edge_index = jnp.stack([src, dst], axis=0)

    a_hat = build_adjacency(edge_index, num_nodes)
    params = make_params(k_p, num_features, num_classes)

    ref_out, ref_emb = reference_forward(a_hat, x, params)

    # tm=256: 2 row tiles, 2 in-kernel K chunks; tm=128: 3 tiles, 3 chunks.
    for tm in (256, 128):
        out, emb = node_gin_forward(a_hat, x, params, num_classes, tm=tm)
        out = jax.block_until_ready(out)
        emb = jax.block_until_ready(emb)
        assert out.shape == (num_nodes, num_classes)
        assert emb.shape == (num_nodes, 3 * HIDDEN)
        assert jnp.allclose(out, ref_out, atol=2e-4, rtol=2e-4), \
            (tm, float(jnp.max(jnp.abs(out - ref_out))))
        assert jnp.allclose(emb, ref_emb, atol=2e-4, rtol=2e-4), \
            (tm, float(jnp.max(jnp.abs(emb - ref_emb))))

    print("KERNEL_OK")
</pallas_src>

<mosaic_0001>
module attributes {stable_mosaic.version = 11 : i64} {
  func.func @gin_stage_kernel(%arg0: i32, %arg1: i32, %arg2: memref<256x512xbf16, #tpu.memory_space<vmem>>, %arg3: memref<512x10xf32, #tpu.memory_space<vmem>>, %arg4: memref<1x10xf32, #tpu.memory_space<vmem>>, %arg5: memref<1x10xf32, #tpu.memory_space<vmem>>, %arg6: memref<10x32xf32, #tpu.memory_space<vmem>>, %arg7: memref<1x32xf32, #tpu.memory_space<vmem>>, %arg8: memref<32x32xf32, #tpu.memory_space<vmem>>, %arg9: memref<1x32xf32, #tpu.memory_space<vmem>>, %arg10: memref<256x32xf32, #tpu.memory_space<vmem>>, %arg11: memref<1x2x32xf32, #tpu.memory_space<vmem>>, %arg12: memref<256x10xf32, #tpu.memory_space<vmem>>) attributes {dimension_semantics = [#tpu.dimension_semantics<parallel>, #tpu.dimension_semantics<arbitrary>], iteration_bounds = array<i64: 2, 1>, scalar_prefetch = 0 : i64, scratch_operands = 1 : i64, tpu.core_type = #tpu.core_type<tc>, window_params = [{transform_indices = @transform_0, window_bounds = array<i64: 256, 512>}, {pipeline_mode = #tpu.pipeline_mode<synchronous>, transform_indices = @transform_1, window_bounds = array<i64: 512, 10>}, {pipeline_mode = #tpu.pipeline_mode<synchronous>, transform_indices = @transform_2, window_bounds = array<i64: 1, 10>}, {pipeline_mode = #tpu.pipeline_mode<synchronous>, transform_indices = @transform_3, window_bounds = array<i64: 1, 10>}, {pipeline_mode = #tpu.pipeline_mode<synchronous>, transform_indices = @transform_4, window_bounds = array<i64: 10, 32>}, {pipeline_mode = #tpu.pipeline_mode<synchronous>, transform_indices = @transform_5, window_bounds = array<i64: 1, 32>}, {pipeline_mode = #tpu.pipeline_mode<synchronous>, transform_indices = @transform_6, window_bounds = array<i64: 32, 32>}, {pipeline_mode = #tpu.pipeline_mode<synchronous>, transform_indices = @transform_7, window_bounds = array<i64: 1, 32>}, {transform_indices = @transform_8, window_bounds = array<i64: 256, 32>}, {transform_indices = @transform_9, window_bounds = array<i64: 1, 2, 32>}]} {
    %c0_i32 = arith.constant 0 : i32
    %0 = arith.cmpi eq, %arg1, %c0_i32 : i32
    %1 = arith.extui %0 : i1 to i32
    %c0_i32_0 = arith.constant 0 : i32
    %2 = arith.cmpi ne, %1, %c0_i32_0 : i32
    scf.if %2 {
      %cst_18 = arith.constant 0.000000e+00 : f32
      %36 = vector.broadcast %cst_18 : f32 to vector<256x10xf32>
      %c0_19 = arith.constant 0 : index
      %c0_20 = arith.constant 0 : index
      %37 = vector.load %arg12[%c0_19, %c0_20] : memref<256x10xf32, #tpu.memory_space<vmem>>, vector<256x10xf32>
      tpu.vector_store %arg12[%c0_19, %c0_20], %36 {strides = array<i32>} : memref<256x10xf32, #tpu.memory_space<vmem>>, vector<256x10xf32>,
    } else {
    }
    %c0 = arith.constant 0 : index
    %c0_1 = arith.constant 0 : index
    %3 = vector.load %arg4[%c0, %c0_1] : memref<1x10xf32, #tpu.memory_space<vmem>>, vector<1x10xf32>
    %c0_2 = arith.constant 0 : index
    %c0_3 = arith.constant 0 : index
    %4 = vector.load %arg5[%c0_2, %c0_3] : memref<1x10xf32, #tpu.memory_space<vmem>>, vector<1x10xf32>
    %c0_4 = arith.constant 0 : index
    %c0_5 = arith.constant 0 : index
    %5 = vector.load %arg12[%c0_4, %c0_5] : memref<256x10xf32, #tpu.memory_space<vmem>>, vector<256x10xf32>
    %c0_6 = arith.constant 0 : index
    %c0_7 = arith.constant 0 : index
    %6 = vector.load %arg2[%c0_6, %c0_7] : memref<256x512xbf16, #tpu.memory_space<vmem>>, vector<256x256xbf16>
    %7 = arith.extf %6 : vector<256x256xbf16> to vector<256x256xf32>
    %c512_i32 = arith.constant 512 : i32
    %8 = arith.muli %arg1, %c512_i32 : i32
    %c0_i32_8 = arith.constant 0 : i32
    %9 = arith.addi %8, %c0_i32_8 : i32
    %10 = tpu.assume_multiple %9, 256 : i32
    %11 = arith.index_cast %10 : i32 to index
    %c0_9 = arith.constant 0 : index
    %12 = vector.load %arg3[%11, %c0_9] : memref<512x10xf32, #tpu.memory_space<vmem>>, vector<256x10xf32>
    %13 = vector.broadcast %3 : vector<1x10xf32> to vector<256x10xf32>
    %14 = arith.mulf %12, %13 : vector<256x10xf32>
    %15 = vector.broadcast %4 : vector<1x10xf32> to vector<256x10xf32>
    %16 = arith.addf %14, %15 : vector<256x10xf32>
    %cst = arith.constant dense<0.000000e+00> : vector<256x10xf32>
    %17 = tpu.matmul %7, %16, %cst {dimension_numbers = #tpu.dot_dimension_numbers<[1], [0], [0], [1], [0, 0, 1, 1], [], []>} : vector<256x256xf32>, vector<256x10xf32>, vector<256x10xf32> -> vector<256x10xf32>
    %18 = arith.addf %5, %17 : vector<256x10xf32>
    %c0_10 = arith.constant 0 : index
    %c256 = arith.constant 256 : index
    %19 = vector.load %arg2[%c0_10, %c256] : memref<256x512xbf16, #tpu.memory_space<vmem>>, vector<256x256xbf16>
    %20 = arith.extf %19 : vector<256x256xbf16> to vector<256x256xf32>
    %c512_i32_11 = arith.constant 512 : i32
    %21 = arith.muli %arg1, %c512_i32_11 : i32
    %c256_i32 = arith.constant 256 : i32
    %22 = arith.addi %21, %c256_i32 : i32
    %23 = tpu.assume_multiple %22, 256 : i32
    %24 = arith.index_cast %23 : i32 to index
    %c0_12 = arith.constant 0 : index
    %25 = vector.load %arg3[%24, %c0_12] : memref<512x10xf32, #tpu.memory_space<vmem>>, vector<256x10xf32>
    %26 = vector.broadcast %3 : vector<1x10xf32> to vector<256x10xf32>
    %27 = arith.mulf %25, %26 : vector<256x10xf32>
    %28 = vector.broadcast %4 : vector<1x10xf32> to vector<256x10xf32>
    %29 = arith.addf %27, %28 : vector<256x10xf32>
    %cst_13 = arith.constant dense<0.000000e+00> : vector<256x10xf32>
    %30 = tpu.matmul %20, %29, %cst_13 {dimension_numbers = #tpu.dot_dimension_numbers<[1], [0], [0], [1], [0, 0, 1, 1], [], []>} : vector<256x256xf32>, vector<256x10xf32>, vector<256x10xf32> -> vector<256x10xf32>
    %31 = arith.addf %18, %30 : vector<256x10xf32>
    %c0_14 = arith.constant 0 : index
    %c0_15 = arith.constant 0 : index
    %32 = vector.load %arg12[%c0_14, %c0_15] : memref<256x10xf32, #tpu.memory_space<vmem>>, vector<256x10xf32>
    tpu.vector_store %arg12[%c0_14, %c0_15], %31 {strides = array<i32>} : memref<256x10xf32, #tpu.memory_space<vmem>>, vector<256x10xf32>,
    %c0_i32_16 = arith.constant 0 : i32
    %33 = arith.cmpi eq, %arg1, %c0_i32_16 : i32
    %34 = arith.extui %33 : i1 to i32
    %c0_i32_17 = arith.constant 0 : i32
    %35 = arith.cmpi ne, %34, %c0_i32_17 : i32
    scf.if %35 {
      %c0_18 = arith.constant 0 : index
      %c0_19 = arith.constant 0 : index
      %36 = vector.load %arg12[%c0_18, %c0_19] : memref<256x10xf32, #tpu.memory_space<vmem>>, vector<256x10xf32>
      %c0_20 = arith.constant 0 : index
      %c0_21 = arith.constant 0 : index
      %37 = vector.load %arg6[%c0_20, %c0_21] : memref<10x32xf32, #tpu.memory_space<vmem>>, vector<10x32xf32>
      %c0_22 = arith.constant 0 : index
      %c0_23 = arith.constant 0 : index
      %38 = vector.load %arg7[%c0_22, %c0_23] : memref<1x32xf32, #tpu.memory_space<vmem>>, vector<1x32xf32>
      %c0_24 = arith.constant 0 : index
      %c0_25 = arith.constant 0 : index
      %39 = vector.load %arg8[%c0_24, %c0_25] : memref<32x32xf32, #tpu.memory_space<vmem>>, vector<32x32xf32>
      %c0_26 = arith.constant 0 : index
      %c0_27 = arith.constant 0 : index
      %40 = vector.load %arg9[%c0_26, %c0_27] : memref<1x32xf32, #tpu.memory_space<vmem>>, vector<1x32xf32>
      %cst_28 = arith.constant dense<0.000000e+00> : vector<256x32xf32>
      %41 = tpu.matmul %36, %37, %cst_28 {dimension_numbers = #tpu.dot_dimension_numbers<[1], [0], [0], [1], [0, 0, 1, 1], [], []>} : vector<256x10xf32>, vector<10x32xf32>, vector<256x32xf32> -> vector<256x32xf32>
      %42 = vector.broadcast %38 : vector<1x32xf32> to vector<256x32xf32>
      %43 = arith.addf %41, %42 : vector<256x32xf32>
      %cst_29 = arith.constant 0.000000e+00 : f32
      %44 = vector.broadcast %cst_29 : f32 to vector<256x32xf32>
      %45 = arith.maximumf %43, %44 : vector<256x32xf32>
      %cst_30 = arith.constant dense<0.000000e+00> : vector<256x32xf32>
      %46 = tpu.matmul %45, %39, %cst_30 {dimension_numbers = #tpu.dot_dimension_numbers<[1], [0], [0], [1], [0, 0, 1, 1], [], []>} : vector<256x32xf32>, vector<32x32xf32>, vector<256x32xf32> -> vector<256x32xf32>
      %47 = vector.broadcast %40 : vector<1x32xf32> to vector<256x32xf32>
      %48 = arith.addf %46, %47 : vector<256x32xf32>
      %cst_31 = arith.constant 0.000000e+00 : f32
      %49 = vector.broadcast %cst_31 : f32 to vector<256x32xf32>
      %50 = arith.maximumf %48, %49 : vector<256x32xf32>
      %c0_32 = arith.constant 0 : index
      %c0_33 = arith.constant 0 : index
      %51 = vector.load %arg10[%c0_32, %c0_33] : memref<256x32xf32, #tpu.memory_space<vmem>>, vector<256x32xf32>
      tpu.vector_store %arg10[%c0_32, %c0_33], %50 {strides = array<i32>} : memref<256x32xf32, #tpu.memory_space<vmem>>, vector<256x32xf32>,
      %52 = tpu.iota {dimensions = array<i32: 1>} : vector<1x256xi32>
      %c256_i32_34 = arith.constant 256 : i32
      %53 = arith.muli %arg0, %c256_i32_34 : i32
      %54 = vector.broadcast %53 : i32 to vector<1x256xi32>
      %55 = arith.addi %52, %54 : vector<1x256xi32>
      %c300_i32 = arith.constant 300 : i32
      %56 = vector.broadcast %c300_i32 : i32 to vector<1x256xi32>
      %57 = arith.cmpi slt, %55, %56 : vector<1x256xi32>
      %58 = arith.extui %57 : vector<1x256xi1> to vector<1x256xi32>
      %59 = arith.sitofp %58 : vector<1x256xi32> to vector<1x256xf32>
      %cst_35 = arith.constant dense<0.000000e+00> : vector<1x32xf32>
      %60 = tpu.matmul %59, %50, %cst_35 {dimension_numbers = #tpu.dot_dimension_numbers<[1], [0], [0], [1], [0, 0, 1, 1], [], []>} : vector<1x256xf32>, vector<256x32xf32>, vector<1x32xf32> -> vector<1x32xf32>
      %c0_36 = arith.constant 0 : index
      %c0_37 = arith.constant 0 : index
      %c0_38 = arith.constant 0 : index
      %61 = vector.load %arg11[%c0_36, %c0_37, %c0_38] : memref<1x2x32xf32, #tpu.memory_space<vmem>>, vector<1x1x32xf32>
      %62 = vector.shape_cast %61 : vector<1x1x32xf32> to vector<1x32xf32>
      %63 = vector.shape_cast %60 : vector<1x32xf32> to vector<1x1x32xf32>
      tpu.vector_store %arg11[%c0_36, %c0_37, %c0_38], %63 {strides = array<i32>} : memref<1x2x32xf32, #tpu.memory_space<vmem>>, vector<1x1x32xf32>,
      %64 = arith.mulf %50, %50 : vector<256x32xf32>
      %cst_39 = arith.constant dense<0.000000e+00> : vector<1x32xf32>
      %65 = tpu.matmul %59, %64, %cst_39 {dimension_numbers = #tpu.dot_dimension_numbers<[1], [0], [0], [1], [0, 0, 1, 1], [], []>} : vector<1x256xf32>, vector<256x32xf32>, vector<1x32xf32> -> vector<1x32xf32>
      %c0_40 = arith.constant 0 : index
      %c1 = arith.constant 1 : index
      %c0_41 = arith.constant 0 : index
      %66 = vector.load %arg11[%c0_40, %c1, %c0_41] : memref<1x2x32xf32, #tpu.memory_space<vmem>>, vector<1x1x32xf32>
      %67 = vector.shape_cast %66 : vector<1x1x32xf32> to vector<1x32xf32>
      %68 = vector.shape_cast %65 : vector<1x32xf32> to vector<1x1x32xf32>
      tpu.vector_store %arg11[%c0_40, %c1, %c0_41], %68 {strides = array<i32>} : memref<1x2x32xf32, #tpu.memory_space<vmem>>, vector<1x1x32xf32>,
    } else {
    }
    return
  }
  func.func @transform_0(%arg0: i32, %arg1: i32) -> (i32, i32) {
    %c0_i32 = arith.constant 0 : i32
    return %arg0, %arg1 : i32, i32
  }
  func.func @transform_1(%arg0: i32, %arg1: i32) -> (i32, i32) {
    %c0_i32 = arith.constant 0 : i32
    %c0_i32_0 = arith.constant 0 : i32
    %c0_i32_1 = arith.constant 0 : i32
    return %c0_i32, %c0_i32_0 : i32, i32
  }
  func.func @transform_2(%arg0: i32, %arg1: i32) -> (i32, i32) {
    %c0_i32 = arith.constant 0 : i32
    %c0_i32_0 = arith.constant 0 : i32
    %c0_i32_1 = arith.constant 0 : i32
    return %c0_i32, %c0_i32_0 : i32, i32
  }
  func.func @transform_3(%arg0: i32, %arg1: i32) -> (i32, i32) {
    %c0_i32 = arith.constant 0 : i32
    %c0_i32_0 = arith.constant 0 : i32
    %c0_i32_1 = arith.constant 0 : i32
    return %c0_i32, %c0_i32_0 : i32, i32
  }
  func.func @transform_4(%arg0: i32, %arg1: i32) -> (i32, i32) {
    %c0_i32 = arith.constant 0 : i32
    %c0_i32_0 = arith.constant 0 : i32
    %c0_i32_1 = arith.constant 0 : i32
    return %c0_i32, %c0_i32_0 : i32, i32
  }
  func.func @transform_5(%arg0: i32, %arg1: i32) -> (i32, i32) {
    %c0_i32 = arith.constant 0 : i32
    %c0_i32_0 = arith.constant 0 : i32
    %c0_i32_1 = arith.constant 0 : i32
    return %c0_i32, %c0_i32_0 : i32, i32
  }
  func.func @transform_6(%arg0: i32, %arg1: i32) -> (i32, i32) {
    %c0_i32 = arith.constant 0 : i32
    %c0_i32_0 = arith.constant 0 : i32
    %c0_i32_1 = arith.constant 0 : i32
    return %c0_i32, %c0_i32_0 : i32, i32
  }
  func.func @transform_7(%arg0: i32, %arg1: i32) -> (i32, i32) {
    %c0_i32 = arith.constant 0 : i32
    %c0_i32_0 = arith.constant 0 : i32
    %c0_i32_1 = arith.constant 0 : i32
    return %c0_i32, %c0_i32_0 : i32, i32
  }
  func.func @transform_8(%arg0: i32, %arg1: i32) -> (i32, i32) {
    %c0_i32 = arith.constant 0 : i32
    %c0_i32_0 = arith.constant 0 : i32
    return %arg0, %c0_i32 : i32, i32
  }
  func.func @transform_9(%arg0: i32, %arg1: i32) -> (i32, i32, i32) {
    %c0_i32 = arith.constant 0 : i32
    %c0_i32_0 = arith.constant 0 : i32
    %c0_i32_1 = arith.constant 0 : i32
    return %arg0, %c0_i32, %c0_i32_0 : i32, i32, i32
  }
}

</mosaic_0001>

<bundles_post_ra>
// kernel: tpu_custom_call.1
= control target key start
LH: loop header
LB: loop body
LE: loop exit
PB: predicated region body
PF: predicated region fallthrough
CT: control target
= control target key end

     0   :  { %15 = vsyncpa [#allocation4], 0  ;;  %s4768_s0 = inlined_call_operand.hbm [shape: bf16[512,512], index: 0, kind: input, shape index: {}]   ;;  %s4769_s1 = inlined_call_operand.vmem [shape: f32[512,10], index: 1, kind: input, shape index: {}]   ;;  %s4770_s2 = inlined_call_operand.vmem [shape: f32[1,10], index: 2, kind: input, shape index: {}]   ;;  %s4771_s3 = inlined_call_operand.vmem [shape: f32[1,10], index: 3, kind: input, shape index: {}]   ;;  %s4772_s4 = inlined_call_operand.vmem [shape: f32[10,32], index: 4, kind: input, shape index: {}]   ;;  %s4773_s5 = inlined_call_operand.vmem [shape: f32[1,32], index: 5, kind: input, shape index: {}]   ;;  %s4774_s6 = inlined_call_operand.vmem [shape: f32[32,32], index: 6, kind: input, shape index: {}]   ;;  %s4775_s7 = inlined_call_operand.vmem [shape: f32[1,32], index: 7, kind: input, shape index: {}]   ;;  %s4776_s8 = inlined_call_operand.vmem [shape: f32[512,32], index: 8, kind: output, shape index: {0}]   ;;  %s4777_s9 = inlined_call_operand.hbm [shape: f32[2,2,32], index: 9, kind: output, shape index: {1}]  }
   0x1   :  { %17 = vsyncpa [#allocation4 + $0x1], 0 }
   0x2   :  { %18 = vsyncpa [#allocation5], 0 }
   0x3   :  { %20 = vsyncpa [#allocation5 + $0x1], 0  ;;  %s3428_s30 = smov 0   ;;  %s3430_s10 = smov 0  }
   0x4   :  { %s3432_s11 = smov 0   ;;  %s3434_s12 = smov 0  }
   0x5   :  { %s3436_s13 = smov 0   ;;  %s3438_s14 = smov 0  }
   0x6 LB: > { %s2522_s15 = sadd.s32 4294967295, %s3368_s14   ;;  %s2523_s16 = sadd.s32 4294967294, %s3368_s14   ;;  %s3368_s14 = sphi %s3438_s14, %s26_s14   ;;  %s3364_s13 = sphi %s3436_s13, %s4799_s13   ;;  %s3360_s12 = sphi %s3434_s12, %s4798_s12   ;;  %s3356_s11 = sphi %s3432_s11, %s4797_s11   ;;  %s3352_s10 = sphi %s3430_s10, %s4796_s10   ;;  %s3348_s30 = sphi %s3428_s30, %s4795_s30  }
   0x7   : > { %s38_s17 = sadd.s32 1, %s3364_s13  ;;  %s47_s18 = sadd.s32 1, %s3356_s11 }
   0x8   : > { %p40_p0 = scmp.ge.s32.totalorder %s38_s17, 2  ;;  %p54_p1 = scmp.ne.s32.totalorder %s3356_s11, %s3352_s10 }
   0x9   : > { %p55_p2 = scmp.eq.s32.totalorder %s3368_s14, 0  ;;  %p60_p3 = scmp.ne.s32.totalorder %s3352_s10, %s3348_s30 }
   0xa   : > { %s4801_s17 = smov (%p40_p0, %s38_s17), 0  ;;  %p61_p5 = scmp.eq.s32.totalorder %s2522_s15, 0 }
   0xb   : > { %4780 = sst [smem:[#allocation9_spill]] %s4801_s17  ;;  %p3469_p4 = por %p55_p2, %p54_p1 }
   0xc   : > { %s42_s20 = ssub.s32 %s3364_s13, %s4801_s17  ;;  %p257_p6 = scmp.eq.s32.totalorder %s2522_s15, 1 }
   0xd   : > { %p45_p7 = scmp.eq.s32.totalorder %s42_s20, 0  ;;  %p3475_p8 = por %p61_p5, %p60_p3 }
   0xe   : > { %p3479_p9 = por %p257_p6, %p54_p1  ;;  %p263_p10 = scmp.eq.s32.totalorder %s2523_s16, 1 }
   0xf   : > { %s3484_s23 = scalar_select %p45_p7, %s3356_s11, %s47_s18  }
  0x10   : > { %s4783_s22 = scalar_select %p3479_p9, 1, 0 }
  0x11   : > { %p3486_p11 = por %p263_p10, %p60_p3  ;;  %p3200_p13 = scmp.lt.s32.totalorder %s3368_s14, 2 }
  0x12   : > { %s304_s25 = sand.u32 1, %s3356_s11   ;;  %s2648_s27 = sshll.u32 %s3364_s13, 13 }
  0x13   : > { %s4784_s24 = scalar_select %p3486_p11, 1, 0 }
  0x14   : > { %s2526_s26 = sshll.u32 %s304_s25, 9  ;;  %s3497_s15 = scalar_lea.hbm %s4768_s0, %s2648_s27 }
  0x15   : > { %s308_s16 = scalar_lea.vmem [#allocation3], %s2526_s26  ;;  %p3503_p0 = pnand %p3200_p13, %p3469_p4 }
  0x16   : > { %s318_s18 = sshll.u32 %s308_s16, 4  ;;  %s3508_s17 = scalar_lea.sflag [#allocation4], %s304_s25  ;;  %s3499_s18 = int_to_ptr.vmem [resolvable:$true] %s318_s18 }
  0x17   : > { %s3256_s27 = scalar_lea.hbm %s3497_s15, 8192  ;;  %p3258_p3 = pneg %p3503_p0 }
  0x18   : > { %p3257_p2 = scmp.ne.s32.totalorder %s3497_s15, %s3256_s27  ;;  %s3261_s19 = scalar_lea.hbm %s4768_s0, 16384 }
  0x19   : > { %p3262_p4 = scmp.lt.u32.totalorder %s3497_s15, %s4768_s0  ;;  %p3263_p7 = scmp.lt.u32.totalorder %s3261_s19, %s3256_s27 }
  0x1a   : > { %p3259_p5 = pnand %p3258_p3, %p3257_p2  ;;  %p3265_p13 = scmp.lt.u32.totalorder %s3256_s27, %s3497_s15 }
  0x1b   : > { %p3264_p10 = por %p3263_p7, %p3262_p4 }
  0x1c   : > { %p3260_p6 = pneg %p3259_p5 }
  0x1d   : > { %p3266_p12 = por %p3265_p13, %p3264_p10 }
  0x1f   : > { %p3267_p1 = pnand %p3266_p12, %p3260_p6 }
  0x21   : > { %3270 = shalt.err (!%p3267_p1)
}
  0x22   : > { %s3271_s25 = scalar_lea.vmem %s3499_s18, 8192  ;;  %s3370_s26 = smov [#allocation3]  }
  0x23   : > { %p3272_p2 = scmp.ne.s32.totalorder %s3499_s18, %s3271_s25  ;;  %s3276_s28 = sshll.u32 %s3370_s26, 4  ;;  %s3277_s28 = int_to_ptr.vmem [resolvable:$false] %s3276_s28 }
  0x24   : > { %s3278_s29 = scalar_lea.vmem %s3277_s28, 16384  ;;  %p3279_p9 = scmp.lt.s32.totalorder %s3499_s18, %s3277_s28 }
  0x25   : > { %p3274_p5 = pnand %p3272_p2, %p3258_p3  ;;  %p3280_p4 = scmp.lt.s32.totalorder %s3278_s29, %s3271_s25 }
  0x27   : > { %p3275_p11 = pneg %p3274_p5  ;;  %p3281_p7 = por %p3280_p4, %p3279_p9 }
  0x29   : > { %p3282_p10 = pnand %p3281_p7, %p3275_p11 }
  0x2b   : > { %3285 = shalt.err (!%p3282_p10)
}
  0x2c   : > { %s3371_s27 = smov 256   ;;  %s3372_s19 = smov 16  }
  0x2d   : > { %3195 = dma.hbm_to_vmem [thread:$0]  (!%p3503_p0), %s3497_s15, 8192, %s3499_s18, %s3508_s17, %s3371_s27, %s3371_s27, %s3372_s19  }
  0x2e   : > { %p326_p12 = scmp.lt.s32.totalorder %s3368_s14, 3  ;;  %p4786_p1 = scmp.ge.s32.totalorder %s3368_s14, 1 }
  0x30   : > { %p327_p3 = pnand %p4786_p1, %p326_p12 }
  0x31   : > { %s3540_s16 = sand.u32 (!%p327_p3), 1, %s3352_s10  }
  0x32   : > { %330 = sbr.rel (%p327_p3) target bundleno = 1262 (0x4ee), region = 52  ;;  %s2531_s25 = sshll.u32 (!%p327_p3), %s3540_s16, 9 }
  0x33   : > { %s333_s26 = scalar_lea.sflag (!%p327_p3), [#allocation4], %s3540_s16  ;;  %s3544_s28 = scalar_lea.vmem (!%p327_p3), [#allocation3], %s2531_s25 }
  0x39   : > { %3339 = dma.done.wait (%p3475_p8), %s333_s26, 8192  }
  0x3a   : > { %3341 = vsyncadd (%p3475_p8), %s333_s26, 4294959104  ;;  %v3373_v0 = vmov 0.0|0.0   ;;  %v3555_v1 = vld [vmem:[%s4770_s2] ss:$0 sm:$0xff]  ;;  %v554_v4 = vld [vmem:[%s4769_s1 + $0x8] sm:$0xff]  ;;  %vm388_vm0 = vcmask 80896  }
  0x3b   : > { %2897 = vmatprep.subr.bf16.mxu0 %v3373_v0  ;;  %3071 = vmatprep.subr.bf16.mxu1 %v3373_v0  ;;  %v3560_v2 = vld [vmem:[%s4771_s3] ss:$0 sm:$0xff]  ;;  %v555_v6 = vld [vmem:[%s4769_s1 + $0x10] sm:$0xff]  ;;  %v556_v7 = vld [vmem:[%s4769_s1 + $0x18] sm:$0xff]  ;;  %v592_v8 = vmul.f32 %v3555_v1, %v554_v4  ;;  %vm1547_vm1 = vcmask 1041408   ;;  %vm3375_vm2 = vmmov 1  }
  0x3c   : > { %v553_v3 = vld [vmem:[%s4769_s1] sm:$0xff]  ;;  %v593_v9 = vmul.f32 %v3555_v1, %v555_v6  ;;  %v594_v10 = vmul.f32 %v3555_v1, %v556_v7  ;;  %v558_v12 = vld [vmem:[%s4769_s1 + $0x28] sm:$0xff]  ;;  %v559_v19 = vld [vmem:[%s4769_s1 + $0x30] sm:$0xff]  ;;  %vm1814_vm4 = vcmask 261120   ;;  %s4357_s27 = sshll.u32 %s3360_s12, 5  ;;  %s2636_s25 = sshll.u32 %s3360_s12, 8 }
  0x3d   : > { %v591_v5 = vmul.f32 %v3555_v1, %v553_v3  ;;  %v557_v11 = vld [vmem:[%s4769_s1 + $0x20] sm:$0xff]  ;;  %v630_v15 = vadd.f32 %v3560_v2, %v592_v8  ;;  %v596_v18 = vmul.f32 %v3555_v1, %v558_v12  ;;  %v560_v20 = vld [vmem:[%s4769_s1 + $0x38] sm:$0xff]  ;;  %v597_v22 = vmul.f32 %v3555_v1, %v559_v19  ;;  %v562_v28 = vld [vmem:[%s4769_s1 + $0x48] sm:$0xff]  ;;  %p379_p8 = scmp.lt.s32.totalorder %s4357_s27, 63  ;;  %s2532_s12 = sshll.u32 %s3540_s16, 1 }
  0x3e   : > { %v595_v14 = vmul.f32 %v3555_v1, %v557_v11  ;;  %v631_v16 = vadd.f32 %v3560_v2, %v593_v9  ;;  %v632_v17 = vadd.f32 %v3560_v2, %v594_v10  ;;  %v598_v26 = vmul.f32 %v3555_v1, %v560_v20  ;;  %v561_v27 = vld [vmem:[%s4769_s1 + $0x40] sm:$0xff]  ;;  %v563_v34 = vld [vmem:[%s4769_s1 + $0x50] sm:$0xff]  ;;  %v564_v35 = vld [vmem:[%s4769_s1 + $0x58] sm:$0xff]  ;;  %s375_s20 = scalar_lea.vmem [#allocation6], %s2532_s12  ;;  %s4719_s19 = scalar_lea.hbm %s4777_s9, %s4357_s27 }
  0x3f   : > { %v629_v13 = vadd.f32 %v3560_v2, %v591_v5  ;;  %v634_v25 = vadd.f32 %v3560_v2, %v596_v18  ;;  %v599_v29 = vmul.f32 %v3555_v1, %v561_v27  ;;  %v635_v31 = vadd.f32 %v3560_v2, %v597_v22  ;;  %v565_v41 = vld [vmem:[%s4769_s1 + $0x60] sm:$0xff]  ;;  %v566_v42 = vld [vmem:[%s4769_s1 + $0x68] sm:$0xff]  ;;  %v567_v43 = vld [vmem:[%s4769_s1 + $0x70] sm:$0xff]  ;;  %s2411_s29 = sshll.u32 %s375_s20, 4  ;;  %p4791_p11 = scmp.ne.s32.totalorder %s4783_s22, 0  ;;  %s4721_s29 = int_to_ptr.vmem [resolvable:$true] %s2411_s29 }
  0x40   : > { %v2901_v23 = vpack.c.bf16 %v632_v17, %v631_v16  ;;  %v633_v24 = vadd.f32 %v3560_v2, %v595_v14  ;;  %v636_v32 = vadd.f32 %v3560_v2, %v598_v26  ;;  %v600_v33 = vmul.f32 %v3555_v1, %v562_v28  ;;  %v3635_v44 = vld [vmem:[%s3544_s28] sm:$0xff]  ;;  %v568_v47 = vld [vmem:[%s4769_s1 + $0x78] sm:$0xff]  ;;  %v2538_v52 = vld [vmem:[%s4769_s1 + $0x108] sm:$0xff]  ;;  %s3377_s17 = smov [#allocation6]  }
  0x41   : > { %v2898_v21 = vpack.c.bf16 %v630_v15, %v629_v13  ;;  %v637_v36 = vadd.f32 %v3560_v2, %v599_v29  ;;  %v601_v39 = vmul.f32 %v3555_v1, %v563_v34  ;;  %v602_v40 = vmul.f32 %v3555_v1, %v564_v35  ;;  %v2537_v48 = vld [vmem:[%s4769_s1 + $0x100] sm:$0xff]  ;;  %v2539_v55 = vld [vmem:[%s4769_s1 + $0x110] sm:$0xff]  ;;  %v2540_v56 = vld [vmem:[%s4769_s1 + $0x118] sm:$0xff]  ;;  %s3290_s15 = sshll.u32 %s3377_s17, 4  ;;  %s3291_s15 = int_to_ptr.vmem [resolvable:$false] %s3290_s15 }
  0x42   : > { %v2904_v30 = vpack.c.bf16 %v634_v25, %v633_v24  ;;  %v2907_v37 = vpack.c.bf16 %v636_v32, %v635_v31  ;;  %v638_v38 = vadd.f32 %v3560_v2, %v600_v33  ;;  %v603_v45 = vmul.f32 %v3555_v1, %v565_v41  ;;  %v569_v58 = vld [vmem:[%s4769_s1 + $0x80] sm:$0xff]  ;;  %v2542_v3 = vld [vmem:[%s4769_s1 + $0x128] sm:$0xff]  ;;  %v2543_v13 = vld [vmem:[%s4769_s1 + $0x130] sm:$0xff]  ;;  %p3293_p13 = scmp.lt.s32.totalorder %s4721_s29, %s3291_s15 }
  0x43   : > { %2899 = vmatpush1.bf16.msra.mxu0 %v2898_v21  ;;  %3087 = vmatpush1.bf16.msra.mxu1 %v2898_v21  ;;  %v604_v46 = vmul.f32 %v3555_v1, %v566_v42  ;;  %v639_v50 = vadd.f32 %v3560_v2, %v601_v39  ;;  %v640_v51 = vadd.f32 %v3560_v2, %v602_v40  ;;  %v488_v54 = vunpack.c.h.bf16 %v3635_v44  ;;  %v2541_v60 = vld [vmem:[%s4769_s1 + $0x120] sm:$0xff]  ;;  %v570_v5 = vld [vmem:[%s4769_s1 + $0x88] sm:$0xff]  ;;  %v2544_v14 = vld [vmem:[%s4769_s1 + $0x138] sm:$0xff] }
  0x44   : > { %2900 = vmatprep.subr.bf16.mxu0 %v3373_v0  ;;  %3072 = vmatprep.subr.bf16.mxu1 %v3373_v0  ;;  %v2910_v49 = vpack.c.bf16 %v638_v38, %v637_v36  ;;  %v605_v53 = vmul.f32 %v3555_v1, %v567_v43  ;;  %v606_v57 = vmul.f32 %v3555_v1, %v568_v47  ;;  %v2545_v19 = vld [vmem:[%s4769_s1 + $0x140] sm:$0xff]  ;;  %v2546_v20 = vld [vmem:[%s4769_s1 + $0x148] sm:$0xff]  ;;  %v572_v26 = vld [vmem:[%s4769_s1 + $0x98] sm:$0xff]  ;;  %vm2283_vm7 = vcmask 253952  }
  0x45   : > { %v1048_v59 = vmul.f32 %v2537_v48, %v3555_v1  ;;  %v641_v61 = vadd.f32 %v3560_v2, %v603_v45  ;;  %v642_v62 = vadd.f32 %v3560_v2, %v604_v46  ;;  %725 = vmatprep.mubr.f32.mxu0 %v488_v54  ;;  %v1049_v63 = vmul.f32 %v2538_v52, %v3555_v1  ;;  %v2547_v34 = vld [vmem:[%s4769_s1 + $0x150] sm:$0xff]  ;;  %v2548_v35 = vld [vmem:[%s4769_s1 + $0x158] sm:$0xff]  ;;  %v2549_v41 = vld [vmem:[%s4769_s1 + $0x160] sm:$0xff] }
  0x46   : > { %v2913_v4 = vpack.c.bf16 %v640_v51, %v639_v50  ;;  %v1050_v7 = vmul.f32 %v2539_v55, %v3555_v1  ;;  %v1051_v8 = vmul.f32 %v2540_v56, %v3555_v1  ;;  %v643_v9 = vadd.f32 %v3560_v2, %v605_v53  ;;  %v574_v45 = vld [vmem:[%s4769_s1 + $0xa8] sm:$0xff]  ;;  %v2551_v53 = vld [vmem:[%s4769_s1 + $0x170] sm:$0xff]  ;;  %v2552_v54 = vld [vmem:[%s4769_s1 + $0x178] sm:$0xff] }
  0x47   : > { %2902 = vmatpush1.bf16.msra.mxu0 %v2901_v23  ;;  %3088 = vmatpush1.bf16.msra.mxu1 %v2901_v23  ;;  %v3679_v6 = vadd.f32 %v3560_v2, %v1048_v59  ;;  %v607_v10 = vmul.f32 %v3555_v1, %v569_v58  ;;  %v3687_v11 = vadd.f32 %v3560_v2, %v1049_v63  ;;  %v571_v23 = vld [vmem:[%s4769_s1 + $0x90] sm:$0xff]  ;;  %v2550_v48 = vld [vmem:[%s4769_s1 + $0x168] sm:$0xff]  ;;  %vm2994_vm3 = vmpackc.low %vm1547_vm1, %vm3375_vm2 }
  0x48   : > { %2903 = vmatprep.subr.bf16.mxu0 %v3373_v0  ;;  %3073 = vmatprep.subr.bf16.mxu1 %v3373_v0  ;;  %v1052_v12 = vmul.f32 %v2541_v60, %v3555_v1  ;;  %v644_v15 = vadd.f32 %v3560_v2, %v606_v57  ;;  %v3698_v16 = vadd.f32 %v3560_v2, %v1050_v7  ;;  %v2554_v63 = vld [vmem:[%s4769_s1 + $0x188] sm:$0xff] }
  0x49   : > { %v3701_v17 = vadd.f32 %v3560_v2, %v1051_v8  ;;  %v1053_v18 = vmul.f32 %v2542_v3, %v3555_v1  ;;  %v2916_v21 = vpack.c.bf16 %v642_v62, %v641_v61  ;;  %v608_v22 = vmul.f32 %v3555_v1, %v570_v5  ;;  %v2553_v62 = vld [vmem:[%s4769_s1 + $0x180] sm:$0xff]  ;;  %v576_v5 = vld [vmem:[%s4769_s1 + $0xb8] sm:$0xff] }
  0x4a   : > { %v2946_v24 = vpack.c.bf16 %v3687_v11, %v3679_v6  ;;  %v3717_v25 = vadd.f32 %v3560_v2, %v1052_v12  ;;  %v1054_v29 = vmul.f32 %v2543_v13, %v3555_v1  ;;  %v645_v31 = vadd.f32 %v3560_v2, %v607_v10 }
  0x4b   : > { %2905 = vmatpush1.bf16.msra.mxu0 %v2904_v30  ;;  %3089 = vmatpush1.bf16.msra.mxu1 %v2904_v30  ;;  %v2949_v27 = vpack.c.bf16 %v3701_v17, %v3698_v16  ;;  %v3726_v28 = vadd.f32 %v3560_v2, %v1053_v18  ;;  %v1055_v30 = vmul.f32 %v2544_v14, %v3555_v1 }
  0x4c   : > { %2906 = vmatprep.subr.bf16.mxu0 %v3373_v0  ;;  %3074 = vmatprep.subr.bf16.mxu1 %v3373_v0  ;;  %v1056_v32 = vmul.f32 %v2545_v19, %v3555_v1  ;;  %v1057_v33 = vmul.f32 %v2546_v20, %v3555_v1  ;;  %v609_v36 = vmul.f32 %v3555_v1, %v571_v23 }
  0x4d   : > { %v2952_v38 = vpack.c.bf16 %v3726_v28, %v3717_v25  ;;  %v3747_v39 = vadd.f32 %v3560_v2, %v1054_v29  ;;  %v3750_v40 = vadd.f32 %v3560_v2, %v1055_v30  ;;  %v2919_v42 = vpack.c.bf16 %v644_v15, %v643_v9  ;;  %v577_v29 = vld [vmem:[%s4769_s1 + $0xc0] sm:$0xff]  ;;  %v462_v28 = vld [vmem:[%s3544_s28 + $0x70] sm:$0xff] }
  0x4e   : > { %v610_v43 = vmul.f32 %v3555_v1, %v572_v26  ;;  %v3760_v46 = vadd.f32 %v3560_v2, %v1056_v32  ;;  %v3763_v47 = vadd.f32 %v3560_v2, %v1057_v33  ;;  %v1058_v51 = vmul.f32 %v2547_v34, %v3555_v1  ;;  %v2558_v32 = vld [vmem:[%s4769_s1 + $0x1a8] sm:$0xff] }
  0x4f   : > { %2908 = vmatpush1.bf16.msra.mxu0 %v2907_v37  ;;  %3090 = vmatpush1.bf16.msra.mxu1 %v2907_v37  ;;  %v573_v37 = vld [vmem:[%s4769_s1 + $0xa0] sm:$0xff]  ;;  %v2955_v50 = vpack.c.bf16 %v3750_v40, %v3747_v39  ;;  %v1059_v52 = vmul.f32 %v2548_v35, %v3555_v1  ;;  %v1060_v57 = vmul.f32 %v2549_v41, %v3555_v1  ;;  %v502_v39 = vunpack.c.h.bf16 %v462_v28 }
  0x50   : > { %2909 = vmatprep.subr.bf16.mxu0 %v3373_v0  ;;  %3075 = vmatprep.subr.bf16.mxu1 %v3373_v0  ;;  %v611_v55 = vmul.f32 %v3555_v1, %v573_v37  ;;  %v2958_v56 = vpack.c.bf16 %v3763_v47, %v3760_v46  ;;  %v612_v58 = vmul.f32 %v3555_v1, %v574_v45  ;;  %v2559_v37 = vld [vmem:[%s4769_s1 + $0x1b0] sm:$0xff]  ;;  %v463_v40 = vld [vmem:[%s3544_s28 + $0x80] sm:$0xff] }
  0x51   : > { %v3787_v59 = vadd.f32 %v3560_v2, %v1058_v51  ;;  %v3790_v60 = vadd.f32 %v3560_v2, %v1059_v52  ;;  %v1061_v61 = vmul.f32 %v2550_v48, %v3555_v1  ;;  %v647_v3 = vadd.f32 %v3560_v2, %v609_v36  ;;  %v2560_v48 = vld [vmem:[%s4769_s1 + $0x1b8] sm:$0xff]  ;;  %v464_v47 = vld [vmem:[%s3544_s28 + $0x90] sm:$0xff] }
  0x52   : > { %v3807_v7 = vadd.f32 %v3560_v2, %v1060_v57  ;;  %v1062_v8 = vmul.f32 %v2551_v53, %v3555_v1  ;;  %v1063_v9 = vmul.f32 %v2552_v54, %v3555_v1  ;;  %v648_v12 = vadd.f32 %v3560_v2, %v610_v43 }
  0x53   : > { %2911 = vmatpush1.bf16.msra.mxu0 %v2910_v49  ;;  %3091 = vmatpush1.bf16.msra.mxu1 %v2910_v49  ;;  %v646_v49 = vadd.f32 %v3560_v2, %v608_v22  ;;  %v2961_v13 = vpack.c.bf16 %v3790_v60, %v3787_v59  ;;  %v3816_v14 = vadd.f32 %v3560_v2, %v1061_v61  ;;  %v2556_v22 = vld [vmem:[%s4769_s1 + $0x198] sm:$0xff]  ;;  %v504_v46 = vunpack.c.h.bf16 %v463_v40  ;;  %v465_v60 = vld [vmem:[%s3544_s28 + $0xa0] sm:$0xff] }
  0x54   : > { %2912 = vmatprep.subr.bf16.mxu0 %v3373_v0  ;;  %3076 = vmatprep.subr.bf16.mxu1 %v3373_v0  ;;  %v3820_v15 = vadd.f32 %v3560_v2, %v1062_v8  ;;  %v3823_v18 = vadd.f32 %v3560_v2, %v1063_v9  ;;  %v1064_v19 = vmul.f32 %v2553_v62, %v3555_v1  ;;  %v2561_v62 = vld [vmem:[%s4769_s1 + $0x1c0] sm:$0xff]  ;;  %v506_v59 = vunpack.c.h.bf16 %v464_v47 }
  0x55   : > { %v2922_v10 = vpack.c.bf16 %v646_v49, %v645_v31  ;;  %v1065_v20 = vmul.f32 %v2554_v63, %v3555_v1  ;;  %v614_v26 = vmul.f32 %v3555_v1, %v576_v5  ;;  %v2964_v30 = vpack.c.bf16 %v3816_v14, %v3807_v7  ;;  %v2557_v31 = vld [vmem:[%s4769_s1 + $0x1a0] sm:$0xff]  ;;  %v578_v49 = vld [vmem:[%s4769_s1 + $0xc8] sm:$0xff]  ;;  %v580_v5 = vld [vmem:[%s4769_s1 + $0xd8] sm:$0xff] }
  0x56   : > { %v649_v33 = vadd.f32 %v3560_v2, %v611_v55  ;;  %v2967_v34 = vpack.c.bf16 %v3823_v18, %v3820_v15  ;;  %v3850_v35 = vadd.f32 %v3560_v2, %v1064_v19  ;;  %v2925_v41 = vpack.c.bf16 %v648_v12, %v647_v3  ;;  %v2562_v63 = vld [vmem:[%s4769_s1 + $0x1c8] sm:$0xff]  ;;  %v476_v14 = vld [vmem:[%s3544_s28 + $0x150] sm:$0xff] }
  0x57   : > { %2914 = vmatpush1.bf16.msra.mxu0 %v2913_v4  ;;  %3092 = vmatpush1.bf16.msra.mxu1 %v2913_v4  ;;  %v575_v4 = vld [vmem:[%s4769_s1 + $0xb0] sm:$0xff]  ;;  %v3853_v36 = vadd.f32 %v3560_v2, %v1065_v20  ;;  %v1067_v45 = vmul.f32 %v2556_v22, %v3555_v1  ;;  %v615_v51 = vmul.f32 %v3555_v1, %v577_v29  ;;  %v505_v7 = vunpack.c.l.bf16 %v464_v47 }
  0x58   : > { %2915 = vmatprep.subr.bf16.mxu0 %v3373_v0  ;;  %3077 = vmatprep.subr.bf16.mxu1 %v3373_v0  ;;  %v613_v23 = vmul.f32 %v3555_v1, %v575_v4  ;;  %v1068_v53 = vmul.f32 %v2557_v31, %v3555_v1  ;;  %v1069_v54 = vmul.f32 %v2558_v32, %v3555_v1  ;;  %v579_v4 = vld [vmem:[%s4769_s1 + $0xd0] sm:$0xff]  ;;  %v530_v15 = vunpack.c.h.bf16 %v476_v14 }
  0x59   : > { %v2970_v52 = vpack.c.bf16 %v3853_v36, %v3850_v35  ;;  %v1070_v61 = vmul.f32 %v2559_v37, %v3555_v1  ;;  %v652_v3 = vadd.f32 %v3560_v2, %v614_v26  ;;  %v1071_v12 = vmul.f32 %v2560_v48, %v3555_v1  ;;  %v2566_v48 = vld [vmem:[%s4769_s1 + $0x1e8] sm:$0xff]  ;;  %v467_v35 = vld [vmem:[%s3544_s28 + $0xc0] sm:$0xff] }
  0x5a   : > { %v651_v55 = vadd.f32 %v3560_v2, %v613_v23  ;;  %v3896_v8 = vadd.f32 %v3560_v2, %v1068_v53  ;;  %v3899_v9 = vadd.f32 %v3560_v2, %v1069_v54  ;;  %v616_v20 = vmul.f32 %v3555_v1, %v578_v49  ;;  %v2564_v23 = vld [vmem:[%s4769_s1 + $0x1d8] sm:$0xff]  ;;  %v581_v49 = vld [vmem:[%s4769_s1 + $0xe0] sm:$0xff]  ;;  %830 = vmatprep.mubr.f32.mxu1 %v530_v15 }
  0x5b   : > { %2917 = vmatpush1.bf16.msra.mxu0 %v2916_v21  ;;  %3093 = vmatpush1.bf16.msra.mxu1 %v2916_v21  ;;  %v2555_v21 = vld [vmem:[%s4769_s1 + $0x190] sm:$0xff]  ;;  %v3910_v22 = vadd.f32 %v3560_v2, %v1070_v61  ;;  %v3919_v29 = vadd.f32 %v3560_v2, %v1071_v12  ;;  %v1072_v31 = vmul.f32 %v2561_v62, %v3555_v1  ;;  %v507_v18 = vunpack.c.l.bf16 %v465_v60 }
  0x5c   : > { %2918 = vmatprep.subr.bf16.mxu0 %v3373_v0  ;;  %3078 = vmatprep.subr.bf16.mxu1 %v3373_v0  ;;  %v1066_v43 = vmul.f32 %v2555_v21, %v3555_v1  ;;  %v2976_v26 = vpack.c.bf16 %v3899_v9, %v3896_v8  ;;  %v1073_v32 = vmul.f32 %v2562_v63, %v3555_v1  ;;  %v2567_v62 = vld [vmem:[%s4769_s1 + $0x1f0] sm:$0xff]  ;;  %v479_v8 = vld [vmem:[%s3544_s28 + $0x180] sm:$0xff] }
  0x5d   : > { %v653_v37 = vadd.f32 %v3560_v2, %v615_v51  ;;  %v3939_v51 = vadd.f32 %v3560_v2, %v1072_v31  ;;  %v1075_v61 = vmul.f32 %v2564_v23, %v3555_v1  ;;  %v2931_v63 = vpack.c.bf16 %v652_v3, %v651_v55  ;;  %v469_v9 = vld [vmem:[%s3544_s28 + $0xe0] sm:$0xff] }
  0x5e   : > { %v3876_v57 = vadd.f32 %v3560_v2, %v1066_v43  ;;  %v618_v43 = vmul.f32 %v3555_v1, %v580_v5  ;;  %v3942_v54 = vadd.f32 %v3560_v2, %v1073_v32  ;;  %v582_v5 = vld [vmem:[%s4769_s1 + $0xe8] sm:$0xff]  ;;  %v1077_v55 = vmul.f32 %v2566_v48, %v3555_v1 }
  0x5f   : > { %2920 = vmatpush1.bf16.msra.mxu0 %v2919_v42  ;;  %3094 = vmatpush1.bf16.msra.mxu1 %v2919_v42  ;;  %v650_v42 = vadd.f32 %v3560_v2, %v612_v58  ;;  %v3879_v58 = vadd.f32 %v3560_v2, %v1067_v45  ;;  %v3964_v31 = vadd.f32 %v3560_v2, %v1075_v61 }
  0x60   : > { %2921 = vmatprep.subr.bf16.mxu0 %v3373_v0  ;;  %3079 = vmatprep.subr.bf16.mxu1 %v3373_v0  ;;  %v619_v3 = vmul.f32 %v3555_v1, %v581_v49  ;;  %v1078_v32 = vmul.f32 %v2567_v62, %v3555_v1  ;;  %v620_v53 = vmul.f32 %v3555_v1, %v582_v5 }
  0x61   : > { %v2928_v19 = vpack.c.bf16 %v650_v42, %v649_v33  ;;  %v2973_v21 = vpack.c.bf16 %v3879_v58, %v3876_v57  ;;  %v2565_v33 = vld [vmem:[%s4769_s1 + $0x1e0] sm:$0xff]  ;;  %v617_v42 = vmul.f32 %v3555_v1, %v579_v4  ;;  %v654_v4 = vadd.f32 %v3560_v2, %v616_v20  ;;  %v478_v57 = vld [vmem:[%s3544_s28 + $0x170] sm:$0xff] }
  0x62   : > { %v3978_v23 = vadd.f32 %v3560_v2, %v1077_v55  ;;  %v656_v49 = vadd.f32 %v3560_v2, %v618_v43  ;;  %v658_v55 = vadd.f32 %v3560_v2, %v620_v53  ;;  %v468_v58 = vld [vmem:[%s3544_s28 + $0xd0] sm:$0xff] }
  0x63   : > { %2923 = vmatpush1.bf16.msra.mxu0 %v2922_v10  ;;  %3095 = vmatpush1.bf16.msra.mxu1 %v2922_v10  ;;  %v2563_v10 = vld [vmem:[%s4769_s1 + $0x1d0] sm:$0xff]  ;;  %v2934_v48 = vpack.c.bf16 %v654_v4, %v653_v37 }
  0x64   : > { %2924 = vmatprep.subr.bf16.mxu0 %v3373_v0  ;;  %3080 = vmatprep.subr.bf16.mxu1 %v3373_v0  ;;  %v1074_v45 = vmul.f32 %v2563_v10, %v3555_v1  ;;  %v1076_v10 = vmul.f32 %v2565_v33, %v3555_v1  ;;  %v655_v33 = vadd.f32 %v3560_v2, %v617_v42 }
  0x65   : > { %v3986_v42 = vadd.f32 %v3560_v2, %v1078_v32 }
  0x66   : > { %v3957_v12 = vadd.f32 %v3560_v2, %v1074_v45  ;;  %v3969_v20 = vadd.f32 %v3560_v2, %v1076_v10  ;;  %v2937_v5 = vpack.c.bf16 %v656_v49, %v655_v33  ;;  %v657_v10 = vadd.f32 %v3560_v2, %v619_v3 }
  0x67   : > { %2926 = vmatpush1.bf16.msra.mxu0 %v2925_v41  ;;  %3096 = vmatpush1.bf16.msra.mxu1 %v2925_v41  ;;  %v2568_v41 = vld [vmem:[%s4769_s1 + $0x1f8] sm:$0xff]  ;;  %v487_v3 = vunpack.c.l.bf16 %v3635_v44  ;;  %v458_v44 = vld [vmem:[%s3544_s28 + $0x30] sm:$0xff] }
  0x68   : > { %2927 = vmatprep.subr.bf16.mxu0 %v3373_v0  ;;  %3081 = vmatprep.subr.bf16.mxu1 %v3373_v0  ;;  %v1079_v45 = vmul.f32 %v2568_v41, %v3555_v1  ;;  %v2985_v61 = vpack.c.bf16 %v3964_v31, %v3957_v12  ;;  %v584_v41 = vld [vmem:[%s4769_s1 + $0xf8] sm:$0xff]  ;;  %v2988_v37 = vpack.c.bf16 %v3978_v23, %v3969_v20  ;;  %v493_v6 = vunpack.c.l.bf16 %v458_v44  ;;  %v482_v12 = vld [vmem:[%s3544_s28 + $0x1b0] sm:$0xff]  ;;  %v483_v23 = vld [vmem:[%s3544_s28 + $0x1c0] sm:$0xff] }
  0x69   : > { %v622_v32 = vmul.f32 %v3555_v1, %v584_v41  ;;  %v472_v31 = vld [vmem:[%s3544_s28 + $0x110] sm:$0xff]  ;;  %v473_v20 = vld [vmem:[%s3544_s28 + $0x120] sm:$0xff] }
  0x6a   : > { %v3989_v62 = vadd.f32 %v3560_v2, %v1079_v45 }
  0x6b   : > { %2929 = vmatpush1.bf16.msra.mxu0 %v2928_v19  ;;  %3097 = vmatpush1.bf16.msra.mxu1 %v2928_v19  ;;  %v583_v19 = vld [vmem:[%s4769_s1 + $0xf0] sm:$0xff] }
  0x6c   : > { %2930 = vmatprep.subr.bf16.mxu0 %v3373_v0  ;;  %3082 = vmatprep.subr.bf16.mxu1 %v3373_v0  ;;  %v2991_v43 = vpack.c.bf16 %v3989_v62, %v3986_v42  ;;  %v621_v4 = vmul.f32 %v3555_v1, %v583_v19  ;;  %v660_v19 = vadd.f32 %v3560_v2, %v622_v32  ;;  %v456_v1 = vld [vmem:[%s3544_s28 + $0x10] sm:$0xff]  ;;  %v477_v32 = vld [vmem:[%s3544_s28 + $0x160] sm:$0xff]  ;;  %v523_v42 = vunpack.c.l.bf16 %v473_v20 }
  0x6d   : > { %v490_v33 = vunpack.c.h.bf16 %v456_v1  ;;  %v532_v36 = vunpack.c.h.bf16 %v477_v32 }
  0x6e   : > { %v659_v45 = vadd.f32 %v3560_v2, %v621_v4  ;;  %v457_v2 = vld [vmem:[%s3544_s28 + $0x20] sm:$0xff]  ;;  %v494_v4 = vunpack.c.h.bf16 %v458_v44 }
  0x6f   : > { %2932 = vmatpush1.bf16.msra.mxu0 %v2931_v63  ;;  %3098 = vmatpush1.bf16.msra.mxu1 %v2931_v63  ;;  %v2940_v63 = vpack.c.bf16 %v658_v55, %v657_v10  ;;  %v492_v49 = vunpack.c.h.bf16 %v457_v2  ;;  %v491_v41 = vunpack.c.l.bf16 %v457_v2  ;;  %v529_v55 = vunpack.c.l.bf16 %v476_v14 }
  0x70   : > { %2933 = vmatprep.subr.bf16.mxu0 %v3373_v0  ;;  %3083 = vmatprep.subr.bf16.mxu1 %v3373_v0  ;;  %v2943_v53 = vpack.c.bf16 %v660_v19, %v659_v45  ;;  %v512_v45 = vunpack.c.h.bf16 %v467_v35  ;;  %v533_v19 = vunpack.c.l.bf16 %v478_v57  ;;  %v513_v2 = vunpack.c.l.bf16 %v468_v58 }
  0x73   : > { %2935 = vmatpush1.bf16.msra.mxu0 %v2934_v48  ;;  %3099 = vmatpush1.bf16.msra.mxu1 %v2934_v48  ;;  %v489_v48 = vunpack.c.l.bf16 %v456_v1  ;;  %v514_v1 = vunpack.c.h.bf16 %v468_v58 }
  0x74   : > { %2936 = vmatprep.subr.bf16.mxu0 %v3373_v0  ;;  %3084 = vmatprep.subr.bf16.mxu1 %v3373_v0 }
  0x77   : > { %2938 = vmatpush1.bf16.msra.mxu0 %v2937_v5  ;;  %3100 = vmatpush1.bf16.msra.mxu1 %v2937_v5  ;;  %v459_v5 = vld [vmem:[%s3544_s28 + $0x40] sm:$0xff] }
  0x78   : > { %2939 = vmatprep.subr.bf16.mxu0 %v3373_v0  ;;  %3085 = vmatprep.subr.bf16.mxu1 %v3373_v0  ;;  %v496_v11 = vunpack.c.h.bf16 %v459_v5  ;;  %v495_v16 = vunpack.c.l.bf16 %v459_v5 }
  0x7b   : > { %2941 = vmatpush1.bf16.msra.mxu0 %v2940_v63  ;;  %3101 = vmatpush1.bf16.msra.mxu1 %v2940_v63 }
  0x7c   : > { %2942 = vmatprep.subr.bf16.mxu0 %v3373_v0  ;;  %3086 = vmatprep.subr.bf16.mxu1 %v3373_v0 }
  0x7f   : > { %2944 = vmatpush1.bf16.msra.mxu0 %v2943_v53  ;;  %3102 = vmatpush1.bf16.msra.mxu1 %v2943_v53  ;;  %v511_v53 = vunpack.c.l.bf16 %v467_v35  ;;  %v3374_v35 = vmov 0.0  }
  0x80   : > { %2945 = vmatprep.subr.bf16.mxu0 %v3373_v0  ;;  %389 = vst.msk [vmem:[#allocation2] sm:$0xff] %vm388_vm0, %v3374_v35  ;;  %390 = vst.msk [vmem:[#allocation2 + $0x8] sm:$0xff] %vm388_vm0, %v3374_v35 }
  0x81   : > { %391 = vst.msk [vmem:[#allocation2 + $0x10] sm:$0xff] %vm388_vm0, %v3374_v35  ;;  %392 = vst.msk [vmem:[#allocation2 + $0x18] sm:$0xff] %vm388_vm0, %v3374_v35 }
  0x82   : > { %726 = vmatmul.mubr.f32.vlgmr.msra.gmra.mrb[0].mxu0 %v487_v3  ;;  %831 = vmatmul.mubr.f32.vlgmr.msra.gmra.mrb[0].mxu1 %v529_v55  ;;  %v4787_v3 = vpack.c.bf16 %v3919_v29, %v3910_v22  ;;  %v480_v22 = vld [vmem:[%s3544_s28 + $0x190] sm:$0xff]  ;;  %393 = vst.msk [vmem:[#allocation2 + $0x20] sm:$0xff] %vm388_vm0, %v3374_v35  ;;  %394 = vst.msk [vmem:[#allocation2 + $0x28] sm:$0xff] %vm388_vm0, %v3374_v35 }
  0x83   : > { %730 = vmatprep.mubr.f32.mxu0 %v490_v33  ;;  %2947 = vmatpush1.bf16.msra.mxu0 %v2946_v24  ;;  %v460_v24 = vld [vmem:[%s3544_s28 + $0x50] sm:$0xff]  ;;  %v535_v33 = vunpack.c.l.bf16 %v479_v8  ;;  %v538_v44 = vunpack.c.h.bf16 %v480_v22  ;;  %395 = vst.msk [vmem:[#allocation2 + $0x30] sm:$0xff] %vm388_vm0, %v3374_v35  ;;  %396 = vst.msk [vmem:[#allocation2 + $0x38] sm:$0xff] %vm388_vm0, %v3374_v35 }
  0x84   : > { %2948 = vmatprep.subr.bf16.mxu0 %v3373_v0  ;;  %v498_v17 = vunpack.c.h.bf16 %v460_v24  ;;  %v497_v10 = vunpack.c.l.bf16 %v460_v24  ;;  %835 = vmatprep.mubr.f32.mxu1 %v532_v36  ;;  %v470_v29 = vld [vmem:[%s3544_s28 + $0xf0] sm:$0xff]  ;;  %397 = vst.msk [vmem:[#allocation2 + $0x40] sm:$0xff] %vm388_vm0, %v3374_v35  ;;  %398 = vst.msk [vmem:[#allocation2 + $0x48] sm:$0xff] %vm388_vm0, %v3374_v35  ;;  %v920_v36 = vld [vmem:[%s3544_s28 + $0x28] sm:$0xff] }
  0x85   : > { %v518_v5 = vunpack.c.h.bf16 %v470_v29  ;;  %v517_v24 = vunpack.c.l.bf16 %v470_v29  ;;  %399 = vst.msk [vmem:[#allocation2 + $0x50] sm:$0xff] %vm388_vm0, %v3374_v35  ;;  %400 = vst.msk [vmem:[#allocation2 + $0x58] sm:$0xff] %vm388_vm0, %v3374_v35 }
  0x86   : > { %731 = vmatmul.mubr.f32.gmra.mrb[2].mxu0 %v489_v48  ;;  %v516_v48 = vunpack.c.h.bf16 %v469_v9  ;;  %401 = vst.msk [vmem:[#allocation2 + $0x60] sm:$0xff] %vm388_vm0, %v3374_v35  ;;  %402 = vst.msk [vmem:[#allocation2 + $0x68] sm:$0xff] %vm388_vm0, %v3374_v35 }
  0x87   : > { %735 = vmatprep.mubr.f32.mxu0 %v492_v49  ;;  %2950 = vmatpush1.bf16.msra.mxu0 %v2949_v27  ;;  %v461_v27 = vld [vmem:[%s3544_s28 + $0x60] sm:$0xff]  ;;  %v4788_v49 = vpack.c.bf16 %v3942_v54, %v3939_v51  ;;  %403 = vst.msk [vmem:[#allocation2 + $0x70] sm:$0xff] %vm388_vm0, %v3374_v35  ;;  %404 = vst.msk [vmem:[#allocation2 + $0x78] sm:$0xff] %vm388_vm0, %v3374_v35 }
  0x88   : > { %2951 = vmatprep.subr.bf16.mxu0 %v3373_v0  ;;  %v500_v25 = vunpack.c.h.bf16 %v461_v27  ;;  %v481_v51 = vld [vmem:[%s3544_s28 + $0x1a0] sm:$0xff]  ;;  %405 = vst.msk [vmem:[#allocation2 + $0x80] sm:$0xff] %vm388_vm0, %v3374_v35  ;;  %406 = vst.msk [vmem:[#allocation2 + $0x88] sm:$0xff] %vm388_vm0, %v3374_v35 }
  0x89   : > { %v471_v54 = vld [vmem:[%s3544_s28 + $0x100] sm:$0xff]  ;;  %407 = vst.msk [vmem:[#allocation2 + $0x90] sm:$0xff] %vm388_vm0, %v3374_v35  ;;  %408 = vst.msk [vmem:[#allocation2 + $0x98] sm:$0xff] %vm388_vm0, %v3374_v35 }
  0x8a   : > { %736 = vmatmul.mubr.f32.gmra.mrb[4].mxu0 %v491_v41  ;;  %v537_v41 = vunpack.c.l.bf16 %v480_v22  ;;  %409 = vst.msk [vmem:[#allocation2 + $0xa0] sm:$0xff] %vm388_vm0, %v3374_v35  ;;  %410 = vst.msk [vmem:[#allocation2 + $0xa8] sm:$0xff] %vm388_vm0, %v3374_v35  ;;  %v926_v22 = vld [vmem:[%s3544_s28 + $0x88] sm:$0xff] }
  0x8b   : > { %740 = vmatprep.mubr.f32.mxu0 %v494_v4  ;;  %2953 = vmatpush1.bf16.msra.mxu0 %v2952_v38  ;;  %v499_v38 = vunpack.c.l.bf16 %v461_v27  ;;  %v515_v4 = vunpack.c.l.bf16 %v469_v9  ;;  %v519_v27 = vunpack.c.l.bf16 %v471_v54  ;;  %411 = vst.msk [vmem:[#allocation2 + $0xb0] sm:$0xff] %vm388_vm0, %v3374_v35  ;;  %412 = vst.msk [vmem:[#allocation2 + $0xb8] sm:$0xff] %vm388_vm0, %v3374_v35  ;;  %v924_v9 = vld [vmem:[%s3544_s28 + $0x68] sm:$0xff] }
  0x8c   : > { %2954 = vmatprep.subr.bf16.mxu0 %v3373_v0  ;;  %413 = vst.msk [vmem:[#allocation2 + $0xc0] sm:$0xff] %vm388_vm0, %v3374_v35  ;;  %414 = vst.msk [vmem:[#allocation2 + $0xc8] sm:$0xff] %vm388_vm0, %v3374_v35 }
  0x8d   : > { %415 = vst.msk [vmem:[#allocation2 + $0xd0] sm:$0xff] %vm388_vm0, %v3374_v35  ;;  %416 = vst.msk [vmem:[#allocation2 + $0xd8] sm:$0xff] %vm388_vm0, %v3374_v35 }
  0x8e   : > { %741 = vmatmul.mubr.f32.gmra.mrb[6].mxu0 %v493_v6  ;;  %v540_v6 = vunpack.c.h.bf16 %v481_v51  ;;  %417 = vst.msk [vmem:[#allocation2 + $0xe0] sm:$0xff] %vm388_vm0, %v3374_v35  ;;  %418 = vst.msk [vmem:[#allocation2 + $0xe8] sm:$0xff] %vm388_vm0, %v3374_v35 }
  0x8f   : > { %745 = vmatprep.mubr.f32.mxu0 %v496_v11  ;;  %2956 = vmatpush1.bf16.msra.mxu0 %v2955_v50  ;;  %v501_v50 = vunpack.c.l.bf16 %v462_v28  ;;  %v539_v11 = vunpack.c.l.bf16 %v481_v51  ;;  %v524_v28 = vunpack.c.h.bf16 %v473_v20  ;;  %419 = vst.msk [vmem:[#allocation2 + $0xf0] sm:$0xff] %vm388_vm0, %v3374_v35  ;;  %420 = vst.msk [vmem:[#allocation2 + $0xf8] sm:$0xff] %vm388_vm0, %v3374_v35  ;;  %v928_v51 = vld [vmem:[%s3544_s28 + $0xa8] sm:$0xff]  ;;  %v941_v35 = vld [vmem:[%s3544_s28 + $0x178] sm:$0xff] }
  0x90   : > { %2957 = vmatprep.subr.bf16.mxu0 %v3373_v0 }
  0x92   : > { %746 = vmatmul.mubr.f32.gmra.mrb[8].mxu0 %v495_v16  ;;  %v520_v16 = vunpack.c.h.bf16 %v471_v54 }
  0x93   : > { %750 = vmatprep.mubr.f32.mxu0 %v498_v17  ;;  %2959 = vmatpush1.bf16.msra.mxu0 %v2958_v56  ;;  %v503_v56 = vunpack.c.l.bf16 %v463_v40  ;;  %v541_v17 = vunpack.c.l.bf16 %v482_v12 }
  0x94   : > { %2960 = vmatprep.subr.bf16.mxu0 %v3373_v0 }
  0x96   : > { %751 = vmatmul.mubr.f32.gmra.mrb[10].mxu0 %v497_v10  ;;  %v522_v10 = vunpack.c.h.bf16 %v472_v31 }
  0x97   : > { %755 = vmatprep.mubr.f32.mxu0 %v500_v25  ;;  %2962 = vmatpush1.bf16.msra.mxu0 %v2961_v13  ;;  %v508_v13 = vunpack.c.h.bf16 %v465_v60  ;;  %v543_v25 = vunpack.c.l.bf16 %v483_v23 }
  0x98   : > { %2963 = vmatprep.subr.bf16.mxu0 %v3373_v0 }
  0x9a   : > { %756 = vmatmul.mubr.f32.gmra.mrb[12].mxu0 %v499_v38  ;;  %v484_v38 = vld [vmem:[%s3544_s28 + $0x1d0] sm:$0xff] }
  0x9b   : > { %760 = vmatprep.mubr.f32.mxu0 %v502_v39  ;;  %2965 = vmatpush1.bf16.msra.mxu0 %v2964_v30  ;;  %v466_v30 = vld [vmem:[%s3544_s28 + $0xb0] sm:$0xff]  ;;  %v546_v40 = vunpack.c.h.bf16 %v484_v38 }
  0x9c   : > { %2966 = vmatprep.subr.bf16.mxu0 %v3373_v0  ;;  %v509_v63 = vunpack.c.l.bf16 %v466_v30  ;;  %v474_v39 = vld [vmem:[%s3544_s28 + $0x130] sm:$0xff] }
  0x9d   : > { %v526_v62 = vunpack.c.h.bf16 %v474_v39 }
  0x9e   : > { %761 = vmatmul.mubr.f32.gmra.mrb[14].mxu0 %v501_v50  ;;  %v545_v50 = vunpack.c.l.bf16 %v484_v38  ;;  %v934_v38 = vld [vmem:[%s3544_s28 + $0x108] sm:$0xff] }
  0x9f   : > { %765 = vmatprep.mubr.f32.mxu0 %v504_v46  ;;  %2968 = vmatpush1.bf16.msra.mxu0 %v2967_v34  ;;  %v510_v34 = vunpack.c.h.bf16 %v466_v30  ;;  %v475_v46 = vld [vmem:[%s3544_s28 + $0x140] sm:$0xff] }
  0xa0   : > { %2969 = vmatprep.subr.bf16.mxu0 %v3373_v0  ;;  %v528_v60 = vunpack.c.h.bf16 %v475_v46  ;;  %v527_v55 = vunpack.c.l.bf16 %v475_v46 }
  0xa2   : > { %766 = vmatmul.mubr.f32.gmra.mrb[16].mxu0 %v503_v56 }
  0xa3   : > { %770 = vmatprep.mubr.f32.mxu0 %v506_v59  ;;  %2971 = vmatpush1.bf16.msra.mxu0 %v2970_v52  ;;  %v531_v52 = vunpack.c.l.bf16 %v477_v32  ;;  %v525_v59 = vunpack.c.l.bf16 %v474_v39 }
  0xa4   : > { %2972 = vmatprep.subr.bf16.mxu0 %v3373_v0 }
  0xa5   : > { %836 = vmatmul.mubr.f32.gmra.mrb[2].mxu1 %v531_v52 }
  0xa6   : > { %771 = vmatmul.mubr.f32.gmra.mrb[18].mxu0 %v505_v7  ;;  %v486_v7 = vld [vmem:[%s3544_s28 + $0x1f0] sm:$0xff] }
  0xa7   : > { %775 = vmatprep.mubr.f32.mxu0 %v508_v13  ;;  %2974 = vmatpush1.bf16.msra.mxu0 %v2973_v21  ;;  %v534_v21 = vunpack.c.h.bf16 %v478_v57  ;;  %v918_v13 = vld [vmem:[%s3544_s28 + $0x8] sm:$0xff]  ;;  %v550_v14 = vunpack.c.h.bf16 %v486_v7  ;;  %v549_v30 = vunpack.c.l.bf16 %v486_v7  ;;  %v954_v57 = vunpack.c.l.bf16 %v920_v36 }
  0xa8   : > { %2975 = vmatprep.subr.bf16.mxu0 %v3373_v0  ;;  %v951_v15 = vunpack.c.h.bf16 %v918_v13  ;;  %v938_v7 = vld [vmem:[%s3544_s28 + $0x148] sm:$0xff] }
  0xa9   : > { %840 = vmatprep.mubr.f32.mxu1 %v534_v21  ;;  %v922_v21 = vld [vmem:[%s3544_s28 + $0x48] sm:$0xff] }
  0xaa   : > { %776 = vmatmul.mubr.f32.gmra.mrb[20].mxu0 %v507_v18  ;;  %841 = vmatmul.mubr.f32.gmra.mrb[4].mxu1 %v533_v19  ;;  %v919_v18 = vld [vmem:[%s3544_s28 + $0x18] sm:$0xff] }
  0xab   : > { %780 = vmatprep.mubr.f32.mxu0 %v510_v34  ;;  %2977 = vmatpush1.bf16.msra.mxu0 %v2976_v26  ;;  %v536_v26 = vunpack.c.h.bf16 %v479_v8  ;;  %v950_v34 = vunpack.c.l.bf16 %v918_v13  ;;  %v953_v32 = vunpack.c.h.bf16 %v919_v18  ;;  %v952_v52 = vunpack.c.l.bf16 %v919_v18  ;;  %v940_v18 = vld [vmem:[%s3544_s28 + $0x168] sm:$0xff] }
  0xac   : > { %2978 = vmatprep.subr.bf16.mxu0 %v3373_v0 }
  0xad   : > { %845 = vmatprep.mubr.f32.mxu1 %v536_v26 }
  0xae   : > { %781 = vmatmul.mubr.f32.gmra.mrb[22].mxu0 %v509_v63  ;;  %846 = vmatmul.mubr.f32.gmra.mrb[6].mxu1 %v535_v33  ;;  %v955_v63 = vunpack.c.h.bf16 %v920_v36  ;;  %v963_v33 = vunpack.c.h.bf16 %v924_v9  ;;  %v994_v36 = vunpack.c.l.bf16 %v940_v18 }
  0xaf   : > { %785 = vmatprep.mubr.f32.mxu0 %v512_v45  ;;  %2980 = vmatpush1.bf16.msra.mxu0 %v4787_v3  ;;  %v921_v45 = vld [vmem:[%s3544_s28 + $0x38] sm:$0xff]  ;;  %v958_v3 = vunpack.c.l.bf16 %v922_v21 }
  0xb0   : > { %2981 = vmatprep.subr.bf16.mxu0 %v3373_v0  ;;  %850 = vmatprep.mubr.f32.mxu1 %v538_v44  ;;  %v957_v58 = vunpack.c.h.bf16 %v921_v45  ;;  %v956_v19 = vunpack.c.l.bf16 %v921_v45  ;;  %v967_v44 = vunpack.c.h.bf16 %v926_v22  ;;  %v996_v45 = vunpack.c.l.bf16 %v941_v35 }
  0xb2   : > { %786 = vmatmul.mubr.f32.gmra.mrb[24].mxu0 %v511_v53  ;;  %851 = vmatmul.mubr.f32.gmra.mrb[8].mxu1 %v537_v41  ;;  %v959_v53 = vunpack.c.h.bf16 %v922_v21  ;;  %v927_v41 = vld [vmem:[%s3544_s28 + $0x98] sm:$0xff]  ;;  %v1437_v21 = vld [vmem:[%s4772_s4] sm:$0xff] }
  0xb3   : > { %790 = vmatprep.mubr.f32.mxu0 %v514_v1  ;;  %2983 = vmatpush1.bf16.msra.mxu0 %v4788_v49  ;;  %v923_v1 = vld [vmem:[%s3544_s28 + $0x58] sm:$0xff]  ;;  %v968_v54 = vunpack.c.l.bf16 %v927_v41 }
  0xb4   : > { %2984 = vmatprep.subr.bf16.mxu0 %v3373_v0  ;;  %855 = vmatprep.mubr.f32.mxu1 %v540_v6  ;;  %v961_v8 = vunpack.c.h.bf16 %v923_v1  ;;  %v960_v26 = vunpack.c.l.bf16 %v923_v1  ;;  %v971_v6 = vunpack.c.h.bf16 %v928_v51 }
  0xb6   : > { %791 = vmatmul.mubr.f32.gmra.mrb[26].mxu0 %v513_v2  ;;  %856 = vmatmul.mubr.f32.gmra.mrb[10].mxu1 %v539_v11  ;;  %v925_v2 = vld [vmem:[%s3544_s28 + $0x78] sm:$0xff] }
  0xb7   : > { %795 = vmatprep.mubr.f32.mxu0 %v516_v48  ;;  %2986 = vmatpush1.bf16.msra.mxu0 %v2985_v61  ;;  %v542_v61 = vunpack.c.h.bf16 %v482_v12  ;;  %v962_v48 = vunpack.c.l.bf16 %v924_v9  ;;  %v965_v49 = vunpack.c.h.bf16 %v925_v2  ;;  %v964_v29 = vunpack.c.l.bf16 %v925_v2  ;;  %v929_v11 = vld [vmem:[%s3544_s28 + $0xb8] sm:$0xff]  ;;  %v930_v12 = vld [vmem:[%s3544_s28 + $0xc8] sm:$0xff] }
  0xb8   : > { %2987 = vmatprep.subr.bf16.mxu0 %v3373_v0 }
  0xb9   : > { %860 = vmatprep.mubr.f32.mxu1 %v542_v61  ;;  %v975_v61 = vunpack.c.h.bf16 %v930_v12 }
  0xba   : > { %796 = vmatmul.mubr.f32.gmra.mrb[28].mxu0 %v515_v4  ;;  %861 = vmatmul.mubr.f32.gmra.mrb[12].mxu1 %v541_v17  ;;  %v966_v4 = vunpack.c.l.bf16 %v926_v22  ;;  %v931_v17 = vld [vmem:[%s3544_s28 + $0xd8] sm:$0xff] }
  0xbb   : > { %800 = vmatprep.mubr.f32.mxu0 %v518_v5  ;;  %2989 = vmatpush1.bf16.msra.mxu0 %v2988_v37  ;;  %v544_v37 = vunpack.c.h.bf16 %v483_v23  ;;  %v969_v5 = vunpack.c.h.bf16 %v927_v41  ;;  %v932_v23 = vld [vmem:[%s3544_s28 + $0xe8] sm:$0xff]  ;;  %v976_v20 = vunpack.c.l.bf16 %v931_v17 }
  0xbc   : > { %2990 = vmatprep.subr.bf16.mxu0 %v3373_v0  ;;  %v521_v0 = vunpack.c.l.bf16 %v472_v31  ;;  %v972_v31 = vunpack.c.l.bf16 %v929_v11 }
  0xbd   : > { %865 = vmatprep.mubr.f32.mxu1 %v544_v37  ;;  %v979_v37 = vunpack.c.h.bf16 %v932_v23 }
  0xbe   : > { %801 = vmatmul.mubr.f32.gmra.mrb[30].mxu0 %v517_v24  ;;  %866 = vmatmul.mubr.f32.gmra.mrb[14].mxu1 %v543_v25  ;;  %v970_v24 = vunpack.c.l.bf16 %v928_v51  ;;  %v933_v25 = vld [vmem:[%s3544_s28 + $0xf8] sm:$0xff] }
  0xbf   : > { %805 = vmatprep.mubr.f32.mxu0 %v520_v16  ;;  %2992 = vmatpush1.bf16.msra.mxu0 %v2991_v43  ;;  %v485_v43 = vld [vmem:[%s3544_s28 + $0x1e0] sm:$0xff]  ;;  %v973_v16 = vunpack.c.h.bf16 %v929_v11  ;;  %v980_v39 = vunpack.c.l.bf16 %v933_v25 }
  0xc0   : > { %870 = vmatprep.mubr.f32.mxu1 %v546_v40  ;;  %v548_v47 = vunpack.c.h.bf16 %v485_v43  ;;  %v547_v56 = vunpack.c.l.bf16 %v485_v43  ;;  %v983_v40 = vunpack.c.h.bf16 %v934_v38  ;;  %v936_v43 = vld [vmem:[%s3544_s28 + $0x128] sm:$0xff] }
  0xc2   : > { %806 = vmatmul.mubr.f32.gmra.mrb[32].mxu0 %v519_v27  ;;  %871 = vmatmul.mubr.f32.gmra.mrb[16].mxu1 %v545_v50  ;;  %v974_v27 = vunpack.c.l.bf16 %v930_v12  ;;  %v935_v50 = vld [vmem:[%s3544_s28 + $0x118] sm:$0xff] }
  0xc3   : > { %810 = vmatprep.mubr.f32.mxu0 %v522_v10  ;;  %875 = vmatprep.mubr.f32.mxu1 %v548_v47  ;;  %v977_v10 = vunpack.c.h.bf16 %v931_v17  ;;  %v984_v46 = vunpack.c.l.bf16 %v935_v50  ;;  %v987_v47 = vunpack.c.h.bf16 %v936_v43 }
  0xc6   : > { %811 = vmatmul.mubr.f32.gmra.mrb[34].mxu0 %v521_v0  ;;  %876 = vmatmul.mubr.f32.gmra.mrb[18].mxu1 %v547_v56  ;;  %v978_v0 = vunpack.c.l.bf16 %v932_v23  ;;  %v937_v56 = vld [vmem:[%s3544_s28 + $0x138] sm:$0xff] }
  0xc7   : > { %815 = vmatprep.mubr.f32.mxu0 %v524_v28  ;;  %880 = vmatprep.mubr.f32.mxu1 %v550_v14  ;;  %v981_v28 = vunpack.c.h.bf16 %v933_v25  ;;  %v988_v13 = vunpack.c.l.bf16 %v937_v56  ;;  %v991_v14 = vunpack.c.h.bf16 %v938_v7 }
  0xca   : > { %816 = vmatmul.mubr.f32.gmra.mrb[36].mxu0 %v523_v42  ;;  %881 = vmatmul.mubr.f32.gmra.mrb[20].mxu1 %v549_v30  ;;  %v982_v42 = vunpack.c.l.bf16 %v934_v38  ;;  %v939_v30 = vld [vmem:[%s3544_s28 + $0x158] sm:$0xff] }
  0xcb   : > { %820 = vmatprep.mubr.f32.mxu0 %v526_v62  ;;  %v985_v62 = vunpack.c.h.bf16 %v935_v50 }
  0xce   : > { %821 = vmatmul.mubr.f32.gmra.mrb[38].mxu0 %v525_v59  ;;  %v986_v59 = vunpack.c.l.bf16 %v936_v43 }
  0xcf   : > { %825 = vmatprep.mubr.f32.mxu0 %v528_v60  ;;  %v989_v60 = vunpack.c.h.bf16 %v937_v56 }
  0xd2   : > { %826 = vmatmul.mubr.f32.gmra.mrb[40].mxu0 %v527_v55  ;;  %v990_v55 = vunpack.c.l.bf16 %v938_v7 }
  0xd3   : > { %1176 = vmatprep.mubr.f32.mxu0 %v951_v15  ;;  %v993_v15 = vunpack.c.h.bf16 %v939_v30 }
  0xd6   : > { %1177 = vmatmul.mubr.f32.vlgmr.msra.gmra.mrb[0].mxu0 %v950_v34  ;;  %v992_v34 = vunpack.c.l.bf16 %v939_v30 }
  0xd7   : > { %1181 = vmatprep.mubr.f32.mxu0 %v953_v32  ;;  %v995_v32 = vunpack.c.h.bf16 %v940_v18  ;;  %v425_v18 = vld [vmem:[#allocation2 + $0x10] sm:$0xff] }
  0xda   : > { %1182 = vmatmul.mubr.f32.gmra.mrb[2].mxu0 %v952_v52  ;;  %v997_v52 = vunpack.c.h.bf16 %v941_v35 }
  0xdb   : > { %1186 = vmatprep.mubr.f32.mxu0 %v955_v63  ;;  %v942_v63 = vld [vmem:[%s3544_s28 + $0x188] sm:$0xff] }
  0xde   : > { %1187 = vmatmul.mubr.f32.gmra.mrb[4].mxu0 %v954_v57  ;;  %v999_v57 = vunpack.c.h.bf16 %v942_v63 }
  0xdf   : > { %1191 = vmatprep.mubr.f32.mxu0 %v957_v58  ;;  %v943_v58 = vld [vmem:[%s3544_s28 + $0x198] sm:$0xff] }
  0xe0   : > { %v1000_v9 = vunpack.c.l.bf16 %v943_v58 }
  0xe2   : > { %1192 = vmatmul.mubr.f32.gmra.mrb[6].mxu0 %v956_v19  ;;  %v1438_v19 = vld [vmem:[%s4772_s4 + $0x8] sm:$0x3] }
  0xe3   : > { %1196 = vmatprep.mubr.f32.mxu0 %v959_v53  ;;  %v998_v53 = vunpack.c.l.bf16 %v942_v63  ;;  %v2993_v1 = vpack.c.bf16 %v1438_v19, %v1437_v21 }
  0xe5   : > { %2995 = vmatprep.subr.msk.bf16.mxu1 %vm2994_vm3, %v2993_v1 }
  0xe6   : > { %1197 = vmatmul.mubr.f32.gmra.mrb[8].mxu0 %v958_v3  ;;  %v1001_v3 = vunpack.c.h.bf16 %v943_v58  ;;  %2998 = vmatpush3.bf16.msk.msra.mxu1 %vm2994_vm3, %v2993_v1  ;;  %v427_v1 = vld [vmem:[#allocation2 + $0x20] sm:$0xff] }
  0xe7   : > { %1201 = vmatprep.mubr.f32.mxu0 %v961_v8  ;;  %v944_v8 = vld [vmem:[%s3544_s28 + $0x1a8] sm:$0xff] }
  0xe8   : > { %v1002_v2 = vunpack.c.l.bf16 %v944_v8 }
  0xea   : > { %1202 = vmatmul.mubr.f32.gmra.mrb[10].mxu0 %v960_v26  ;;  %v1003_v26 = vunpack.c.h.bf16 %v944_v8 }
  0xeb   : > { %1206 = vmatprep.mubr.f32.mxu0 %v963_v33  ;;  %v945_v33 = vld [vmem:[%s3544_s28 + $0x1b8] sm:$0xff] }
  0xec   : > { %v1004_v22 = vunpack.c.l.bf16 %v945_v33 }
  0xee   : > { %1207 = vmatmul.mubr.f32.gmra.mrb[12].mxu0 %v962_v48  ;;  %v1005_v48 = vunpack.c.h.bf16 %v945_v33  ;;  %v428_v33 = vld [vmem:[#allocation2 + $0x28] sm:$0xff] }
  0xef   : > { %1211 = vmatprep.mubr.f32.mxu0 %v965_v49  ;;  %v946_v49 = vld [vmem:[%s3544_s28 + $0x1c8] sm:$0xff] }
  0xf0   : > { %v1006_v41 = vunpack.c.l.bf16 %v946_v49 }
  0xf2   : > { %1212 = vmatmul.mubr.f32.gmra.mrb[14].mxu0 %v964_v29  ;;  %v1007_v29 = vunpack.c.h.bf16 %v946_v49 }
  0xf3   : > { %1216 = vmatprep.mubr.f32.mxu0 %v967_v44  ;;  %v947_v44 = vld [vmem:[%s3544_s28 + $0x1d8] sm:$0xff] }
  0xf4   : > { %v1008_v51 = vunpack.c.l.bf16 %v947_v44 }
  0xf6   : > { %1217 = vmatmul.mubr.f32.gmra.mrb[16].mxu0 %v966_v4  ;;  %v1009_v4 = vunpack.c.h.bf16 %v947_v44 }
  0xf7   : > { %1221 = vmatprep.mubr.f32.mxu0 %v969_v5  ;;  %v948_v5 = vld [vmem:[%s3544_s28 + $0x1e8] sm:$0xff] }
  0xf8   : > { %v1010_v11 = vunpack.c.l.bf16 %v948_v5 }
  0xfa   : > { %1222 = vmatmul.mubr.f32.gmra.mrb[18].mxu0 %v968_v54  ;;  %v1011_v54 = vunpack.c.h.bf16 %v948_v5 }
  0xfb   : > { %1226 = vmatprep.mubr.f32.mxu0 %v971_v6  ;;  %v949_v6 = vld [vmem:[%s3544_s28 + $0x1f8] sm:$0xff]  ;;  %s380_s28 = scalar_select %p379_p8, %s4357_s27, 63 }
  0xfd   : > { %s2534_s26 = sshll.u32 %s380_s28, 3 }
  0xfe   : > { %1227 = vmatmul.mubr.f32.gmra.mrb[20].mxu0 %v970_v24  ;;  %v1013_v24 = vunpack.c.h.bf16 %v949_v6  ;;  %s4375_s18 = scalar_lea.vmem %s4776_s8, %s2534_s26  ;;  %s3286_s26 = scalar_lea.vmem %s4721_s29, 32 }
  0xff   : > { %1231 = vmatprep.mubr.f32.mxu0 %v973_v16  ;;  %v1012_v16 = vunpack.c.l.bf16 %v949_v6  ;;  %p3287_p9 = scmp.ne.s32.totalorder %s4721_s29, %s3286_s26 }
 0x101   : > { %p3288_p0 = pnand %p3287_p9, %p4791_p11 }
 0x102   : > { %1232 = vmatmul.mubr.f32.gmra.mrb[22].mxu0 %v972_v31 }
 0x103   : > { %1236 = vmatprep.mubr.f32.mxu0 %v975_v61  ;;  %p3289_p6 = pneg %p3288_p0 }
 0x106   : > { %1237 = vmatmul.mubr.f32.gmra.mrb[24].mxu0 %v974_v27 }
 0x107   : > { %1241 = vmatprep.mubr.f32.mxu0 %v977_v10 }
 0x10a   : > { %1242 = vmatmul.mubr.f32.gmra.mrb[26].mxu0 %v976_v20 }
 0x10b   : > { %1246 = vmatprep.mubr.f32.mxu0 %v979_v37 }
 0x10e   : > { %1247 = vmatmul.mubr.f32.gmra.mrb[28].mxu0 %v978_v0 }
 0x10f   : > { %1251 = vmatprep.mubr.f32.mxu0 %v981_v28 }
 0x112   : > { %1252 = vmatmul.mubr.f32.gmra.mrb[30].mxu0 %v980_v39 }
 0x113   : > { %1256 = vmatprep.mubr.f32.mxu0 %v983_v40 }
 0x116   : > { %1257 = vmatmul.mubr.f32.gmra.mrb[32].mxu0 %v982_v42 }
 0x117   : > { %1261 = vmatprep.mubr.f32.mxu0 %v985_v62 }
 0x11a   : > { %1262 = vmatmul.mubr.f32.gmra.mrb[34].mxu0 %v984_v46 }
 0x11b   : > { %1266 = vmatprep.mubr.f32.mxu0 %v987_v47 }
 0x11e   : > { %1267 = vmatmul.mubr.f32.gmra.mrb[36].mxu0 %v986_v59  ;;  %v423_v59 = vld [vmem:[#allocation2] sm:$0xff] }
 0x11f   : > { %1271 = vmatprep.mubr.f32.mxu0 %v989_v60 }
 0x122   : > { %1272 = vmatmul.mubr.f32.gmra.mrb[38].mxu0 %v988_v13 }
 0x123   : > { %1276 = vmatprep.mubr.f32.mxu0 %v991_v14  ;;  %v424_v14 = vld [vmem:[#allocation2 + $0x8] sm:$0xff] }
 0x126   : > { %1277 = vmatmul.mubr.f32.gmra.mrb[40].mxu0 %v990_v55 }
 0x127   : > { %1281 = vmatprep.mubr.f32.mxu0 %v993_v15 }
 0x12a   : > { %1282 = vmatmul.mubr.f32.gmra.mrb[42].mxu0 %v992_v34  ;;  %v1440_v34 = vld [vmem:[%s4774_s6] sm:$0xff] }
 0x12b   : > { %1286 = vmatprep.mubr.f32.mxu0 %v995_v32  ;;  %v1441_v32 = vld [vmem:[%s4774_s6 + $0x8] sm:$0xff] }
 0x12e   : > { %1287 = vmatmul.mubr.f32.gmra.mrb[44].mxu0 %v994_v36  ;;  %v2999_v36 = vpack.c.bf16 %v1441_v32, %v1440_v34 }
 0x12f   : > { %1291 = vmatprep.mubr.f32.mxu0 %v997_v52 }
 0x130   : > { %3000 = vmatprep.subr.bf16.mxu1 %v2999_v36 }
 0x132   : > { %1292 = vmatmul.mubr.f32.gmra.mrb[46].mxu0 %v996_v45 }
 0x133   : > { %1296 = vmatprep.mubr.f32.mxu0 %v999_v57  ;;  %v426_v57 = vld [vmem:[#allocation2 + $0x18] sm:$0xff] }
 0x136   : > { %1297 = vmatmul.mubr.f32.gmra.mrb[48].mxu0 %v998_v53 }
 0x137   : > { %1301 = vmatprep.mubr.f32.mxu0 %v1001_v3 }
 0x13a   : > { %1302 = vmatmul.mubr.f32.gmra.mrb[50].mxu0 %v1000_v9 }
 0x13b   : > { %1306 = vmatprep.mubr.f32.mxu0 %v1003_v26 }
 0x13e   : > { %1307 = vmatmul.mubr.f32.gmra.mrb[52].mxu0 %v1002_v2 }
 0x13f   : > { %1311 = vmatprep.mubr.f32.mxu0 %v1005_v48 }
 0x142   : > { %1312 = vmatmul.mubr.f32.gmra.mrb[54].mxu0 %v1004_v22 }
 0x143   : > { %1316 = vmatprep.mubr.f32.mxu0 %v1007_v29  ;;  %v429_v29 = vld [vmem:[#allocation2 + $0x30] sm:$0xff] }
 0x146   : > { %1317 = vmatmul.mubr.f32.gmra.mrb[56].mxu0 %v1006_v41 }
 0x147   : > { %1321 = vmatprep.mubr.f32.mxu0 %v1009_v4 }
 0x14a   : > { %1322 = vmatmul.mubr.f32.gmra.mrb[58].mxu0 %v1008_v51  ;;  %v430_v51 = vld [vmem:[#allocation2 + $0x38] sm:$0xff] }
 0x14b   : > { %1326 = vmatprep.mubr.f32.mxu0 %v1011_v54 }
 0x14e   : > { %1327 = vmatmul.mubr.f32.gmra.mrb[60].mxu0 %v1010_v11 }
 0x14f   : > { %1331 = vmatprep.mubr.f32.mxu0 %v1013_v24 }
 0x152   : > { %1332 = vmatmul.mubr.f32.gmra.mrb[62].mxu0 %v1012_v16  ;;  %v431_v16 = vld [vmem:[#allocation2 + $0x40] sm:$0xff] }
 0x155   : > { %v4178_v12 = vpop.f32.mrb[0].mxu1 }
 0x156   : > { %v834_v31 = vpop.f32.mrb[1].mxu1 }
 0x178   : > { %v4180_v61 = vpop.f32.mrb[2].mxu1 }
 0x179   : > { %v839_v17 = vpop.f32.mrb[3].mxu1 }
 0x17d   : > { %v4182_v27 = vpop.f32.mrb[4].mxu1 }
 0x17e   : > { %v844_v10 = vpop.f32.mrb[5].mxu1 }
 0x181   : > { %v4184_v23 = vpop.f32.mrb[6].mxu1 }
 0x182   : > { %v849_v20 = vpop.f32.mrb[7].mxu1 }
 0x185   : > { %v4186_v37 = vpop.f32.mrb[8].mxu1 }
 0x186   : > { %v854_v25 = vpop.f32.mrb[9].mxu1 }
 0x187   : > { %v432_v25 = vld [vmem:[#allocation2 + $0x48] sm:$0xff] }
 0x189   : > { %v4188_v0 = vpop.f32.mrb[10].mxu1 }
 0x18a   : > { %v859_v28 = vpop.f32.mrb[11].mxu1 }
 0x18d   : > { %v4190_v38 = vpop.f32.mrb[12].mxu1 }
 0x18e   : > { %v864_v39 = vpop.f32.mrb[13].mxu1 }
 0x191   : > { %v4192_v40 = vpop.f32.mrb[14].mxu1 }
 0x192   : > { %v869_v50 = vpop.f32.mrb[15].mxu1 }
 0x195   : > { %v4194_v42 = vpop.f32.mrb[16].mxu1 }
 0x196   : > { %v874_v62 = vpop.f32.mrb[17].mxu1 }
 0x199   : > { %v4196_v43 = vpop.f32.mrb[18].mxu1 }
 0x19a   : > { %v879_v46 = vpop.f32.mrb[19].mxu1 }
 0x19b   : > { %v433_v46 = vld [vmem:[#allocation2 + $0x50] sm:$0xff] }
 0x19d   : > { %v4198_v47 = vpop.f32.mrb[20].mxu1 }
 0x19e   : > { %v884_v56 = vpop.f32.mrb[21].mxu1 }
 0x1a9   : > { %v1178_v60 = vpop.f32.mrb[0].mxu0 }
 0x1aa   : > { %v3103_v7 = vadd.f32 %v1178_v60, %v423_v59  ;;  %v1180_v13 = vpop.f32.mrb[1].mxu0 }
 0x1ab   : > { %v434_v13 = vld [vmem:[#allocation2 + $0x58] sm:$0xff] }
 0x1ac   : > { %1370 = vst.msk [vmem:[#allocation2] sm:$0xff] %vm388_vm0, %v3103_v7 }
 0x1ad   : > { %v1183_v30 = vpop.f32.mrb[2].mxu0 }
 0x1ae   : > { %v3104_v55 = vadd.f32 %v1183_v30, %v424_v14  ;;  %v1185_v15 = vpop.f32.mrb[3].mxu0 }
 0x1b0   : > { %1371 = vst.msk [vmem:[#allocation2 + $0x8] sm:$0xff] %vm388_vm0, %v3104_v55 }
 0x1b1   : > { %v1188_v35 = vpop.f32.mrb[4].mxu0 }
 0x1b2   : > { %v3105_v52 = vadd.f32 %v1188_v35, %v425_v18  ;;  %v1190_v63 = vpop.f32.mrb[5].mxu0  ;;  %v435_v18 = vld [vmem:[#allocation2 + $0x60] sm:$0xff] }
 0x1b3   : > { %v1405_v45 = vld [vmem:[#allocation2] sm:$0xff] }
 0x1b4   : > { %1372 = vst.msk [vmem:[#allocation2 + $0x10] sm:$0xff] %vm388_vm0, %v3105_v52  ;;  %2793 = vmatprep.mubr.msk.f32.mxu1 %vm388_vm0, %v1405_v45  ;;  %v436_v52 = vld [vmem:[#allocation2 + $0x68] sm:$0xff] }
 0x1b5   : > { %v1193_v58 = vpop.f32.mrb[6].mxu0 }
 0x1b6   : > { %v3106_v21 = vadd.f32 %v1193_v58, %v426_v57  ;;  %v1195_v19 = vpop.f32.mrb[7].mxu0 }
 0x1b7   : > { %v1406_v53 = vld [vmem:[#allocation2 + $0x8] sm:$0xff] }
 0x1b8   : > { %1373 = vst.msk [vmem:[#allocation2 + $0x18] sm:$0xff] %vm388_vm0, %v3106_v21  ;;  %2794 = vmatmul.mubr.msk.f32.vlgmr.msra.gmra.mrb[22].mxu1 %vm388_vm0, %v1406_v53  ;;  %v437_v21 = vld [vmem:[#allocation2 + $0x70] sm:$0xff] }
 0x1b9   : > { %v1198_v3 = vpop.f32.mrb[8].mxu0  ;;  %3002 = vmatpush3.bf16.msra.mxu1 %v2999_v36 }
 0x1ba   : > { %v3107_v8 = vadd.f32 %v1198_v3, %v427_v1  ;;  %v1200_v9 = vpop.f32.mrb[9].mxu0 }
 0x1bb   : > { %v1407_v26 = vld [vmem:[#allocation2 + $0x10] sm:$0xff] }
 0x1bc   : > { %1374 = vst.msk [vmem:[#allocation2 + $0x20] sm:$0xff] %vm388_vm0, %v3107_v8  ;;  %2796 = vmatprep.mubr.msk.f32.mxu1 %vm388_vm0, %v1407_v26  ;;  %v438_v8 = vld [vmem:[#allocation2 + $0x78] sm:$0xff] }
 0x1bd   : > { %v1203_v2 = vpop.f32.mrb[10].mxu0 }
 0x1be   : > { %v3108_v48 = vadd.f32 %v1203_v2, %v428_v33  ;;  %v1205_v49 = vpop.f32.mrb[11].mxu0 }
 0x1bf   : > { %v1408_v22 = vld [vmem:[#allocation2 + $0x18] sm:$0xff] }
 0x1c0   : > { %1375 = vst.msk [vmem:[#allocation2 + $0x28] sm:$0xff] %vm388_vm0, %v3108_v48  ;;  %2797 = vmatmul.mubr.msk.f32.gmra.mrb[24].mxu1 %vm388_vm0, %v1408_v22  ;;  %v439_v48 = vld [vmem:[#allocation2 + $0x80] sm:$0xff] }
 0x1c1   : > { %v1208_v44 = vpop.f32.mrb[12].mxu0 }
 0x1c2   : > { %v3109_v41 = vadd.f32 %v1208_v44, %v429_v29  ;;  %v1210_v4 = vpop.f32.mrb[13].mxu0 }
 0x1c3   : > { %v1409_v5 = vld [vmem:[#allocation2 + $0x20] sm:$0xff] }
 0x1c4   : > { %1376 = vst.msk [vmem:[#allocation2 + $0x30] sm:$0xff] %vm388_vm0, %v3109_v41  ;;  %2799 = vmatprep.mubr.msk.f32.mxu1 %vm388_vm0, %v1409_v5  ;;  %v440_v41 = vld [vmem:[#allocation2 + $0x88] sm:$0xff] }
 0x1c5   : > { %v1213_v54 = vpop.f32.mrb[14].mxu0 }
 0x1c6   : > { %v3110_v6 = vadd.f32 %v1213_v54, %v430_v51  ;;  %v1215_v11 = vpop.f32.mrb[15].mxu0 }
 0x1c7   : > { %v1410_v24 = vld [vmem:[#allocation2 + $0x28] sm:$0xff] }
 0x1c8   : > { %1377 = vst.msk [vmem:[#allocation2 + $0x38] sm:$0xff] %vm388_vm0, %v3110_v6  ;;  %2800 = vmatmul.mubr.msk.f32.gmra.mrb[26].mxu1 %vm388_vm0, %v1410_v24  ;;  %v441_v6 = vld [vmem:[#allocation2 + $0x90] sm:$0xff] }
 0x1c9   : > { %v1218_v31 = vpop.f32.mrb[16].mxu0 }
 0x1ca   : > { %v3111_v17 = vadd.f32 %v1218_v31, %v431_v16  ;;  %v1220_v10 = vpop.f32.mrb[17].mxu0 }
 0x1cb   : > { %v1411_v20 = vld [vmem:[#allocation2 + $0x30] sm:$0xff] }
 0x1cc   : > { %1378 = vst.msk [vmem:[#allocation2 + $0x40] sm:$0xff] %vm388_vm0, %v3111_v17  ;;  %2802 = vmatprep.mubr.msk.f32.mxu1 %vm388_vm0, %v1411_v20  ;;  %v442_v17 = vld [vmem:[#allocation2 + $0x98] sm:$0xff] }
 0x1cd   : > { %v1223_v28 = vpop.f32.mrb[18].mxu0 }
 0x1ce   : > { %v3112_v39 = vadd.f32 %v1223_v28, %v432_v25  ;;  %v1225_v50 = vpop.f32.mrb[19].mxu0 }
 0x1cf   : > { %v1412_v62 = vld [vmem:[#allocation2 + $0x38] sm:$0xff]  ;;  %v444_v50 = vld [vmem:[#allocation2 + $0xa8] sm:$0xff] }
 0x1d0   : > { %1379 = vst.msk [vmem:[#allocation2 + $0x48] sm:$0xff] %vm388_vm0, %v3112_v39  ;;  %2803 = vmatmul.mubr.msk.f32.gmra.mrb[28].mxu1 %vm388_vm0, %v1412_v62  ;;  %v443_v39 = vld [vmem:[#allocation2 + $0xa0] sm:$0xff] }
 0x1d1   : > { %v1228_v56 = vpop.f32.mrb[20].mxu0 }
 0x1d2   : > { %v3113_v59 = vadd.f32 %v1228_v56, %v433_v46  ;;  %v1230_v60 = vpop.f32.mrb[21].mxu0  ;;  %v907_v56 = vadd.f32 %v4178_v12, %v444_v50 }
 0x1d3   : > { %v1413_v7 = vld [vmem:[#allocation2 + $0x40] sm:$0xff] }
 0x1d4   : > { %1380 = vst.msk [vmem:[#allocation2 + $0x50] sm:$0xff] %vm388_vm0, %v3113_v59  ;;  %2805 = vmatprep.mubr.msk.f32.mxu1 %vm388_vm0, %v1413_v7  ;;  %v445_v7 = vld [vmem:[#allocation2 + $0xb0] sm:$0xff] }
 0x1d5   : > { %v1233_v14 = vpop.f32.mrb[22].mxu0 }
 0x1d6   : > { %v3114_v30 = vadd.f32 %v1233_v14, %v434_v13  ;;  %v1235_v55 = vpop.f32.mrb[23].mxu0 }
 0x1d7   : > { %v1414_v15 = vld [vmem:[#allocation2 + $0x48] sm:$0xff] }
 0x1d8   : > { %1381 = vst.msk [vmem:[#allocation2 + $0x58] sm:$0xff] %vm388_vm0, %v3114_v30  ;;  %2806 = vmatmul.mubr.msk.f32.gmra.mrb[30].mxu1 %vm388_vm0, %v1414_v15  ;;  %v908_v30 = vadd.f32 %v4180_v61, %v445_v7 }
 0x1d9   : > { %v1238_v34 = vpop.f32.mrb[24].mxu0 }
 0x1da   : > { %v3115_v32 = vadd.f32 %v1238_v34, %v435_v18  ;;  %v1240_v35 = vpop.f32.mrb[25].mxu0  ;;  %v446_v18 = vld [vmem:[#allocation2 + $0xb8] sm:$0xff] }
 0x1db   : > { %v1415_v36 = vld [vmem:[#allocation2 + $0x50] sm:$0xff] }
 0x1dc   : > { %1382 = vst.msk [vmem:[#allocation2 + $0x60] sm:$0xff] %vm388_vm0, %v3115_v32  ;;  %2808 = vmatprep.mubr.msk.f32.mxu1 %vm388_vm0, %v1415_v36  ;;  %v909_v32 = vadd.f32 %v4182_v27, %v446_v18 }
 0x1dd   : > { %v1243_v63 = vpop.f32.mrb[26].mxu0 }
 0x1de   : > { %v3116_v45 = vadd.f32 %v1243_v63, %v436_v52  ;;  %v1245_v57 = vpop.f32.mrb[27].mxu0  ;;  %v447_v52 = vld [vmem:[#allocation2 + $0xc0] sm:$0xff] }
 0x1df   : > { %v1416_v58 = vld [vmem:[#allocation2 + $0x58] sm:$0xff] }
 0x1e0   : > { %1383 = vst.msk [vmem:[#allocation2 + $0x68] sm:$0xff] %vm388_vm0, %v3116_v45  ;;  %2809 = vmatmul.mubr.msk.f32.gmra.mrb[32].mxu1 %vm388_vm0, %v1416_v58  ;;  %v910_v45 = vadd.f32 %v4184_v23, %v447_v52  ;;  %v1443_v23 = vld [vmem:[%s4774_s6 + $0x18] sm:$0xff] }
 0x1e1   : > { %v1248_v19 = vpop.f32.mrb[28].mxu0 }
 0x1e2   : > { %v3117_v53 = vadd.f32 %v1248_v19, %v437_v21  ;;  %v1250_v1 = vpop.f32.mrb[29].mxu0  ;;  %v448_v21 = vld [vmem:[#allocation2 + $0xc8] sm:$0xff] }
 0x1e3   : > { %v1417_v3 = vld [vmem:[#allocation2 + $0x60] sm:$0xff] }
 0x1e4   : > { %1384 = vst.msk [vmem:[#allocation2 + $0x70] sm:$0xff] %vm388_vm0, %v3117_v53  ;;  %2811 = vmatprep.mubr.msk.f32.mxu1 %vm388_vm0, %v1417_v3  ;;  %v911_v53 = vadd.f32 %v4186_v37, %v448_v21 }
 0x1e5   : > { %v1253_v9 = vpop.f32.mrb[30].mxu0 }
 0x1e6   : > { %v3118_v26 = vadd.f32 %v1253_v9, %v438_v8  ;;  %v1255_v33 = vpop.f32.mrb[31].mxu0  ;;  %v449_v8 = vld [vmem:[#allocation2 + $0xd0] sm:$0xff] }
 0x1e7   : > { %v1418_v2 = vld [vmem:[#allocation2 + $0x68] sm:$0xff]  ;;  %v1442_v9 = vld [vmem:[%s4774_s6 + $0x10] sm:$0xff]  ;;  %v912_v37 = vadd.f32 %v4188_v0, %v449_v8 }
 0x1e8   : > { %1385 = vst.msk [vmem:[#allocation2 + $0x78] sm:$0xff] %vm388_vm0, %v3118_v26  ;;  %2812 = vmatmul.mubr.msk.f32.gmra.mrb[34].mxu1 %vm388_vm0, %v1418_v2  ;;  %v3003_v33 = vpack.c.bf16 %v1443_v23, %v1442_v9 }
 0x1e9   : > { %v1258_v49 = vpop.f32.mrb[32].mxu0 }
 0x1ea   : > { %v3119_v22 = vadd.f32 %v1258_v49, %v439_v48  ;;  %v1260_v29 = vpop.f32.mrb[33].mxu0  ;;  %3004 = vmatprep.subr.bf16.mxu1 %v3003_v33 }
 0x1eb   : > { %v1419_v44 = vld [vmem:[#allocation2 + $0x70] sm:$0xff]  ;;  %3006 = vmatpush3.bf16.msra.mxu1 %v3003_v33 }
 0x1ec   : > { %1386 = vst.msk [vmem:[#allocation2 + $0x80] sm:$0xff] %vm388_vm0, %v3119_v22  ;;  %2814 = vmatprep.mubr.msk.f32.mxu1 %vm388_vm0, %v1419_v44  ;;  %v450_v22 = vld [vmem:[#allocation2 + $0xd8] sm:$0xff] }
 0x1ed   : > { %v1263_v4 = vpop.f32.mrb[34].mxu0 }
 0x1ee   : > { %v3120_v5 = vadd.f32 %v1263_v4, %v440_v41  ;;  %v1265_v51 = vpop.f32.mrb[35].mxu0  ;;  %v913_v41 = vadd.f32 %v4190_v38, %v450_v22 }
 0x1ef   : > { %v1420_v54 = vld [vmem:[#allocation2 + $0x78] sm:$0xff]  ;;  %v451_v51 = vld [vmem:[#allocation2 + $0xe0] sm:$0xff] }
 0x1f0   : > { %1387 = vst.msk [vmem:[#allocation2 + $0x88] sm:$0xff] %vm388_vm0, %v3120_v5  ;;  %2815 = vmatmul.mubr.msk.f32.gmra.mrb[36].mxu1 %vm388_vm0, %v1420_v54 }
 0x1f1   : > { %v1268_v11 = vpop.f32.mrb[36].mxu0 }
 0x1f2   : > { %v3121_v24 = vadd.f32 %v1268_v11, %v441_v6  ;;  %v1270_v16 = vpop.f32.mrb[37].mxu0  ;;  %v914_v6 = vadd.f32 %v4192_v40, %v451_v51 }
 0x1f3   : > { %v1421_v31 = vld [vmem:[#allocation2 + $0x80] sm:$0xff]  ;;  %v452_v16 = vld [vmem:[#allocation2 + $0xe8] sm:$0xff] }
 0x1f4   : > { %1388 = vst.msk [vmem:[#allocation2 + $0x90] sm:$0xff] %vm388_vm0, %v3121_v24  ;;  %2817 = vmatprep.mubr.msk.f32.mxu1 %vm388_vm0, %v1421_v31 }
 0x1f5   : > { %v1273_v10 = vpop.f32.mrb[38].mxu0 }
 0x1f6   : > { %v3122_v20 = vadd.f32 %v1273_v10, %v442_v17  ;;  %v1275_v25 = vpop.f32.mrb[39].mxu0  ;;  %v915_v17 = vadd.f32 %v4194_v42, %v452_v16 }
 0x1f7   : > { %v1422_v28 = vld [vmem:[#allocation2 + $0x88] sm:$0xff]  ;;  %v453_v25 = vld [vmem:[#allocation2 + $0xf0] sm:$0xff] }
 0x1f8   : > { %1389 = vst.msk [vmem:[#allocation2 + $0x98] sm:$0xff] %vm388_vm0, %v3122_v20  ;;  %2818 = vmatmul.mubr.msk.f32.gmra.mrb[38].mxu1 %vm388_vm0, %v1422_v28 }
 0x1f9   : > { %v1278_v62 = vpop.f32.mrb[40].mxu0 }
 0x1fa   : > { %v3123_v46 = vadd.f32 %v1278_v62, %v443_v39  ;;  %v1280_v59 = vpop.f32.mrb[41].mxu0  ;;  %v916_v39 = vadd.f32 %v4196_v43, %v453_v25 }
 0x1fb   : > { %v1423_v60 = vld [vmem:[#allocation2 + $0x90] sm:$0xff] }
 0x1fc   : > { %1390 = vst.msk [vmem:[#allocation2 + $0xa0] sm:$0xff] %vm388_vm0, %v3123_v46  ;;  %2820 = vmatprep.mubr.msk.f32.mxu1 %vm388_vm0, %v1423_v60  ;;  %v454_v46 = vld [vmem:[#allocation2 + $0xf8] sm:$0xff] }
 0x1fd   : > { %v1283_v13 = vpop.f32.mrb[42].mxu0  ;;  %v917_v59 = vadd.f32 %v4198_v47, %v454_v46  ;;  %v4290_v47 = vld [vmem:[%s4773_s5] ss:$0 sm:$0xff] }
 0x1fe   : > { %v1358_v14 = vadd.f32 %v1283_v13, %v907_v56  ;;  %v1285_v55 = vpop.f32.mrb[43].mxu0 }
 0x1ff   : > { %v1424_v15 = vld [vmem:[#allocation2 + $0x98] sm:$0xff] }
 0x200   : > { %1391 = vst.msk [vmem:[#allocation2 + $0xa8] sm:$0xff] %vm388_vm0, %v1358_v14  ;;  %2821 = vmatmul.mubr.msk.f32.gmra.mrb[40].mxu1 %vm388_vm0, %v1424_v15 }
 0x201   : > { %v1288_v34 = vpop.f32.mrb[44].mxu0 }
 0x202   : > { %v1359_v12 = vadd.f32 %v1288_v34, %v908_v30  ;;  %v1290_v35 = vpop.f32.mrb[45].mxu0 }
 0x203   : > { %v1425_v36 = vld [vmem:[#allocation2 + $0xa0] sm:$0xff] }
 0x204   : > { %1392 = vst.msk [vmem:[#allocation2 + $0xb0] sm:$0xff] %vm388_vm0, %v1359_v12  ;;  %2823 = vmatprep.mubr.msk.f32.mxu1 %vm388_vm0, %v1425_v36 }
 0x205   : > { %v1293_v63 = vpop.f32.mrb[46].mxu0 }
 0x206   : > { %v1360_v61 = vadd.f32 %v1293_v63, %v909_v32  ;;  %v1295_v57 = vpop.f32.mrb[47].mxu0 }
 0x207   : > { %v1426_v58 = vld [vmem:[#allocation2 + $0xa8] sm:$0xff] }
 0x208   : > { %1393 = vst.msk [vmem:[#allocation2 + $0xb8] sm:$0xff] %vm388_vm0, %v1360_v61  ;;  %2824 = vmatmul.mubr.msk.f32.gmra.mrb[42].mxu1 %vm388_vm0, %v1426_v58 }
 0x209   : > { %v1298_v19 = vpop.f32.mrb[48].mxu0 }
 0x20a   : > { %v1361_v27 = vadd.f32 %v1298_v19, %v910_v45  ;;  %v1300_v1 = vpop.f32.mrb[49].mxu0 }
 0x20b   : > { %v1427_v3 = vld [vmem:[#allocation2 + $0xb0] sm:$0xff] }
 0x20c   : > { %1394 = vst.msk [vmem:[#allocation2 + $0xc0] sm:$0xff] %vm388_vm0, %v1361_v27  ;;  %2826 = vmatprep.mubr.msk.f32.mxu1 %vm388_vm0, %v1427_v3 }
 0x20d   : > { %v1303_v26 = vpop.f32.mrb[50].mxu0 }
 0x20e   : > { %v1362_v2 = vadd.f32 %v1303_v26, %v911_v53  ;;  %v1305_v48 = vpop.f32.mrb[51].mxu0 }
 0x20f   : > { %v1428_v49 = vld [vmem:[#allocation2 + $0xb8] sm:$0xff] }
 0x210   : > { %1395 = vst.msk [vmem:[#allocation2 + $0xc8] sm:$0xff] %vm388_vm0, %v1362_v2  ;;  %2827 = vmatmul.mubr.msk.f32.gmra.mrb[44].mxu1 %vm388_vm0, %v1428_v49 }
 0x211   : > { %v1308_v29 = vpop.f32.mrb[52].mxu0 }
 0x212   : > { %v1363_v44 = vadd.f32 %v1308_v29, %v912_v37  ;;  %v1310_v4 = vpop.f32.mrb[53].mxu0 }
 0x213   : > { %v1429_v5 = vld [vmem:[#allocation2 + $0xc0] sm:$0xff] }
 0x214   : > { %1396 = vst.msk [vmem:[#allocation2 + $0xd0] sm:$0xff] %vm388_vm0, %v1363_v44  ;;  %2829 = vmatprep.mubr.msk.f32.mxu1 %vm388_vm0, %v1429_v5 }
 0x215   : > { %v1313_v0 = vpop.f32.mrb[54].mxu0 }
 0x216   : > { %v1364_v54 = vadd.f32 %v1313_v0, %v913_v41  ;;  %v1315_v11 = vpop.f32.mrb[55].mxu0 }
 0x217   : > { %v1430_v24 = vld [vmem:[#allocation2 + $0xc8] sm:$0xff] }
 0x218   : > { %1397 = vst.msk [vmem:[#allocation2 + $0xd8] sm:$0xff] %vm388_vm0, %v1364_v54  ;;  %2830 = vmatmul.mubr.msk.f32.gmra.mrb[46].mxu1 %vm388_vm0, %v1430_v24 }
 0x219   : > { %v1318_v31 = vpop.f32.mrb[56].mxu0 }
 0x21a   : > { %v1365_v38 = vadd.f32 %v1318_v31, %v914_v6  ;;  %v1320_v10 = vpop.f32.mrb[57].mxu0 }
 0x21b   : > { %v1431_v20 = vld [vmem:[#allocation2 + $0xd0] sm:$0xff] }
 0x21c   : > { %1398 = vst.msk [vmem:[#allocation2 + $0xe0] sm:$0xff] %vm388_vm0, %v1365_v38  ;;  %2832 = vmatprep.mubr.msk.f32.mxu1 %vm388_vm0, %v1431_v20 }
 0x21d   : > { %v1323_v28 = vpop.f32.mrb[58].mxu0 }
 0x21e   : > { %v1366_v40 = vadd.f32 %v1323_v28, %v915_v17  ;;  %v1325_v50 = vpop.f32.mrb[59].mxu0 }
 0x21f   : > { %v1432_v62 = vld [vmem:[#allocation2 + $0xd8] sm:$0xff] }
 0x220   : > { %1399 = vst.msk [vmem:[#allocation2 + $0xe8] sm:$0xff] %vm388_vm0, %v1366_v40  ;;  %2833 = vmatmul.mubr.msk.f32.gmra.mrb[48].mxu1 %vm388_vm0, %v1432_v62 }
 0x221   : > { %v1328_v56 = vpop.f32.mrb[60].mxu0 }
 0x222   : > { %v1367_v42 = vadd.f32 %v1328_v56, %v916_v39  ;;  %v1330_v60 = vpop.f32.mrb[61].mxu0 }
 0x223   : > { %v1433_v7 = vld [vmem:[#allocation2 + $0xe0] sm:$0xff] }
 0x224   : > { %1400 = vst.msk [vmem:[#allocation2 + $0xf0] sm:$0xff] %vm388_vm0, %v1367_v42  ;;  %2835 = vmatprep.mubr.msk.f32.mxu1 %vm388_vm0, %v1433_v7 }
 0x225   : > { %v1333_v13 = vpop.f32.mrb[62].mxu0 }
 0x226   : > { %v1368_v14 = vadd.f32 %v1333_v13, %v917_v59  ;;  %v1335_v43 = vpop.f32.mrb[63].mxu0 }
 0x227   : > { %v1434_v30 = vld [vmem:[#allocation2 + $0xe8] sm:$0xff] }
 0x228   : > { %1401 = vst.msk [vmem:[#allocation2 + $0xf8] sm:$0xff] %vm388_vm0, %v1368_v14  ;;  %2836 = vmatmul.mubr.msk.f32.gmra.mrb[50].mxu1 %vm388_vm0, %v1434_v30 }
 0x22b   : > { %v1435_v55 = vld [vmem:[#allocation2 + $0xf0] sm:$0xff] }
 0x22c   : > { %2838 = vmatprep.mubr.msk.f32.mxu1 %vm388_vm0, %v1435_v55 }
 0x22f   : > { %v1436_v15 = vld [vmem:[#allocation2 + $0xf8] sm:$0xff] }
 0x230   : > { %2839 = vmatmul.mubr.msk.f32.gmra.mrb[52].mxu1 %vm388_vm0, %v1436_v15 }
 0x28b   : > { %v2795_v18 = vpop.f32.mrb[22].mxu1 }
 0x28c   : > { %v1623_v34 = vadd.f32 %v2795_v18, %v4290_v47  ;;  %v1617_v12 = vpop.f32.mrb[23].mxu1 }
 0x28d   : > { %v1618_v32 = vadd.f32 %v4290_v47, %v1617_v12 }
 0x28e   : > { %v1777_v36 = vmax.f32 %v1623_v34, 0.0 }
 0x28f   : > { %v1776_v35 = vmax.f32 %v1618_v32, 0.0 }
 0x291   : > { %2849 = vmatprep.mubr.msk.f32.mxu1 %vm1814_vm4, %v1776_v35 }
 0x292   : > { %2850 = vmatmul.mubr.msk.f32.vlgmr.msra.gmra.mrb[54].mxu1 %vm1814_vm4, %v1777_v36 }
 0x293   : > { %v2798_v52 = vpop.f32.mrb[24].mxu1 }
 0x294   : > { %v1633_v63 = vadd.f32 %v2798_v52, %v4290_v47  ;;  %v1627_v61 = vpop.f32.mrb[25].mxu1 }
 0x295   : > { %v1628_v45 = vadd.f32 %v4290_v47, %v1627_v61 }
 0x296   : > { %v1779_v58 = vmax.f32 %v1633_v63, 0.0 }
 0x297   : > { %v1778_v57 = vmax.f32 %v1628_v45, 0.0 }
 0x299   : > { %2852 = vmatprep.mubr.msk.f32.mxu1 %vm1814_vm4, %v1778_v57 }
 0x29a   : > { %2853 = vmatmul.mubr.msk.f32.gmra.mrb[56].mxu1 %vm1814_vm4, %v1779_v58 }
 0x29b   : > { %v2801_v21 = vpop.f32.mrb[26].mxu1 }
 0x29c   : > { %v1643_v19 = vadd.f32 %v2801_v21, %v4290_v47  ;;  %v1637_v27 = vpop.f32.mrb[27].mxu1 }
 0x29d   : > { %v1638_v53 = vadd.f32 %v4290_v47, %v1637_v27 }
 0x29e   : > { %v1781_v3 = vmax.f32 %v1643_v19, 0.0 }
 0x29f   : > { %v1780_v1 = vmax.f32 %v1638_v53, 0.0 }
 0x2a1   : > { %2855 = vmatprep.mubr.msk.f32.mxu1 %vm1814_vm4, %v1780_v1 }
 0x2a2   : > { %2856 = vmatmul.mubr.msk.f32.gmra.mrb[58].mxu1 %vm1814_vm4, %v1781_v3 }
 0x2a3   : > { %v2804_v8 = vpop.f32.mrb[28].mxu1 }
 0x2a4   : > { %v1653_v9 = vadd.f32 %v2804_v8, %v4290_v47  ;;  %v1647_v23 = vpop.f32.mrb[29].mxu1 }
 0x2a5   : > { %v1648_v26 = vadd.f32 %v4290_v47, %v1647_v23 }
 0x2a6   : > { %v1783_v2 = vmax.f32 %v1653_v9, 0.0 }
 0x2a7   : > { %v1782_v33 = vmax.f32 %v1648_v26, 0.0 }
 0x2a9   : > { %2858 = vmatprep.mubr.msk.f32.mxu1 %vm1814_vm4, %v1782_v33 }
 0x2aa   : > { %2859 = vmatmul.mubr.msk.f32.gmra.mrb[60].mxu1 %vm1814_vm4, %v1783_v2 }
 0x2ab   : > { %v2807_v37 = vpop.f32.mrb[30].mxu1 }
 0x2ac   : > { %v1663_v48 = vadd.f32 %v2807_v37, %v4290_v47  ;;  %v1657_v49 = vpop.f32.mrb[31].mxu1 }
 0x2ad   : > { %v1658_v22 = vadd.f32 %v4290_v47, %v1657_v49 }
 0x2ae   : > { %v1785_v44 = vmax.f32 %v1663_v48, 0.0 }
 0x2af   : > { %v1784_v29 = vmax.f32 %v1658_v22, 0.0 }
 0x2b1   : > { %2861 = vmatprep.mubr.msk.f32.mxu1 %vm1814_vm4, %v1784_v29 }
 0x2b2   : > { %2862 = vmatmul.mubr.msk.f32.gmra.mrb[62].mxu1 %vm1814_vm4, %v1785_v44 }
 0x2b3   : > { %v2810_v41 = vpop.f32.mrb[32].mxu1 }
 0x2b4   : > { %v1673_v4 = vadd.f32 %v2810_v41, %v4290_v47  ;;  %v1667_v5 = vpop.f32.mrb[33].mxu1 }
 0x2b5   : > { %v1668_v51 = vadd.f32 %v4290_v47, %v1667_v5 }
 0x2b6   : > { %v1787_v54 = vmax.f32 %v1673_v4, 0.0 }
 0x2b7   : > { %v1786_v0 = vmax.f32 %v1668_v51, 0.0  ;;  %v2200_v51 = vlaneseq }
 0x2b9   : > { %2864 = vmatprep.mubr.msk.f32.mxu1 %vm1814_vm4, %v1786_v0  ;;  %v2201_v0 = vand.u32 127, %v2200_v51 }
 0x2ba   : > { %2865 = vmatmul.mubr.msk.f32.gmra.mrb[64].mxu1 %vm1814_vm4, %v1787_v54  ;;  %v4364_v54 = vld [vmem:[%s4775_s7] ss:$0 sm:$0xff] }
 0x2bb   : > { %v2813_v6 = vpop.f32.mrb[34].mxu1 }
 0x2bc   : > { %v1683_v11 = vadd.f32 %v2813_v6, %v4290_v47  ;;  %v1677_v24 = vpop.f32.mrb[35].mxu1  ;;  %v2204_v6 = vstv %s2636_s25  ;;  %s2394_s25 = scalar_lea.sflag [#allocation5], %s3540_s16 }
 0x2bd   : > { %v1678_v16 = vadd.f32 %v4290_v47, %v1677_v24 }
 0x2be   : > { %v1789_v38 = vmax.f32 %v1683_v11, 0.0 }
 0x2bf   : > { %v1788_v31 = vmax.f32 %v1678_v16, 0.0 }
 0x2c1   : > { %2867 = vmatprep.mubr.msk.f32.mxu1 %vm1814_vm4, %v1788_v31 }
 0x2c2   : > { %2868 = vmatmul.mubr.msk.f32.gmra.mrb[66].mxu1 %vm1814_vm4, %v1789_v38  ;;  %v4370_v38 = vadd.s32 %v2204_v6, %v2201_v0 }
 0x2c3   : > { %v2816_v17 = vpop.f32.mrb[36].mxu1 }
 0x2c4   : > { %v1693_v10 = vadd.f32 %v2816_v17, %v4290_v47  ;;  %v1687_v20 = vpop.f32.mrb[37].mxu1  ;;  %vm2207_vm6 = vcmp.lt.s32.totalorder %v4370_v38, 300 }
 0x2c5   : > { %v1688_v25 = vadd.f32 %v4290_v47, %v1687_v20  ;;  %v3376_v20 = vmov 1.0  }
 0x2c6   : > { %v1791_v40 = vmax.f32 %v1693_v10, 0.0 }
 0x2c7   : > { %v1790_v28 = vmax.f32 %v1688_v25, 0.0 }
 0x2c9   : > { %2870 = vmatprep.mubr.msk.f32.mxu1 %vm1814_vm4, %v1790_v28 }
 0x2ca   : > { %2871 = vmatmul.mubr.msk.f32.gmra.mrb[68].mxu1 %vm1814_vm4, %v1791_v40 }
 0x2cb   : > { %v2819_v39 = vpop.f32.mrb[38].mxu1 }
 0x2cc   : > { %v1703_v50 = vadd.f32 %v2819_v39, %v4290_v47  ;;  %v1697_v62 = vpop.f32.mrb[39].mxu1 }
 0x2cd   : > { %v1698_v46 = vadd.f32 %v4290_v47, %v1697_v62 }
 0x2ce   : > { %v1793_v42 = vmax.f32 %v1703_v50, 0.0 }
 0x2cf   : > { %v1792_v56 = vmax.f32 %v1698_v46, 0.0 }
 0x2d1   : > { %2873 = vmatprep.mubr.msk.f32.mxu1 %vm1814_vm4, %v1792_v56 }
 0x2d2   : > { %2874 = vmatmul.mubr.msk.f32.gmra.mrb[70].mxu1 %vm1814_vm4, %v1793_v42 }
 0x2d3   : > { %v2822_v59 = vpop.f32.mrb[40].mxu1 }
 0x2d4   : > { %v1713_v60 = vadd.f32 %v2822_v59, %v4290_v47  ;;  %v1707_v7 = vpop.f32.mrb[41].mxu1 }
 0x2d5   : > { %v1708_v13 = vadd.f32 %v4290_v47, %v1707_v7 }
 0x2d6   : > { %v1795_v43 = vmax.f32 %v1713_v60, 0.0 }
 0x2d7   : > { %v1794_v14 = vmax.f32 %v1708_v13, 0.0 }
 0x2d9   : > { %2876 = vmatprep.mubr.msk.f32.mxu1 %vm1814_vm4, %v1794_v14 }
 0x2da   : > { %2877 = vmatmul.mubr.msk.f32.gmra.mrb[72].mxu1 %vm1814_vm4, %v1795_v43 }
 0x2db   : > { %v2825_v30 = vpop.f32.mrb[42].mxu1 }
 0x2dc   : > { %v1723_v55 = vadd.f32 %v2825_v30, %v4290_v47  ;;  %v1717_v15 = vpop.f32.mrb[43].mxu1 }
 0x2dd   : > { %v1718_v18 = vadd.f32 %v4290_v47, %v1717_v15 }
 0x2de   : > { %v1797_v12 = vmax.f32 %v1723_v55, 0.0 }
 0x2df   : > { %v1796_v34 = vmax.f32 %v1718_v18, 0.0 }
 0x2e1   : > { %2879 = vmatprep.mubr.msk.f32.mxu1 %vm1814_vm4, %v1796_v34 }
 0x2e2   : > { %2880 = vmatmul.mubr.msk.f32.gmra.mrb[74].mxu1 %vm1814_vm4, %v1797_v12 }
 0x2e3   : > { %v2828_v32 = vpop.f32.mrb[44].mxu1 }
 0x2e4   : > { %v1733_v35 = vadd.f32 %v2828_v32, %v4290_v47  ;;  %v1727_v36 = vpop.f32.mrb[45].mxu1 }
 0x2e5   : > { %v1728_v52 = vadd.f32 %v4290_v47, %v1727_v36 }
 0x2e6   : > { %v1799_v61 = vmax.f32 %v1733_v35, 0.0 }
 0x2e7   : > { %v1798_v63 = vmax.f32 %v1728_v52, 0.0 }
 0x2e9   : > { %2882 = vmatprep.mubr.msk.f32.mxu1 %vm1814_vm4, %v1798_v63 }
 0x2ea   : > { %2883 = vmatmul.mubr.msk.f32.gmra.mrb[76].mxu1 %vm1814_vm4, %v1799_v61 }
 0x2eb   : > { %v2831_v45 = vpop.f32.mrb[46].mxu1 }
 0x2ec   : > { %v1743_v57 = vadd.f32 %v2831_v45, %v4290_v47  ;;  %v1737_v58 = vpop.f32.mrb[47].mxu1 }
 0x2ed   : > { %v1738_v21 = vadd.f32 %v4290_v47, %v1737_v58 }
 0x2ee   : > { %v1801_v27 = vmax.f32 %v1743_v57, 0.0 }
 0x2ef   : > { %v1800_v19 = vmax.f32 %v1738_v21, 0.0 }
 0x2f1   : > { %2885 = vmatprep.mubr.msk.f32.mxu1 %vm1814_vm4, %v1800_v19 }
 0x2f2   : > { %2886 = vmatmul.mubr.msk.f32.gmra.mrb[78].mxu1 %vm1814_vm4, %v1801_v27 }
 0x2f3   : > { %v2834_v53 = vpop.f32.mrb[48].mxu1 }
 0x2f4   : > { %v1753_v1 = vadd.f32 %v2834_v53, %v4290_v47  ;;  %v1747_v3 = vpop.f32.mrb[49].mxu1 }
 0x2f5   : > { %v1748_v8 = vadd.f32 %v4290_v47, %v1747_v3 }
 0x2f6   : > { %v1803_v23 = vmax.f32 %v1753_v1, 0.0 }
 0x2f7   : > { %v1802_v9 = vmax.f32 %v1748_v8, 0.0 }
 0x2f9   : > { %2888 = vmatprep.mubr.msk.f32.mxu1 %vm1814_vm4, %v1802_v9 }
 0x2fa   : > { %2889 = vmatmul.mubr.msk.f32.gmra.mrb[80].mxu1 %vm1814_vm4, %v1803_v23 }
 0x2fb   : > { %v2837_v26 = vpop.f32.mrb[50].mxu1 }
 0x2fc   : > { %v1763_v33 = vadd.f32 %v2837_v26, %v4290_v47  ;;  %v1757_v2 = vpop.f32.mrb[51].mxu1 }
 0x2fd   : > { %v1758_v37 = vadd.f32 %v4290_v47, %v1757_v2 }
 0x2fe   : > { %v1805_v49 = vmax.f32 %v1763_v33, 0.0 }
 0x2ff   : > { %v1804_v48 = vmax.f32 %v1758_v37, 0.0 }
 0x301   : > { %2891 = vmatprep.mubr.msk.f32.mxu1 %vm1814_vm4, %v1804_v48 }
 0x302   : > { %2892 = vmatmul.mubr.msk.f32.gmra.mrb[82].mxu1 %vm1814_vm4, %v1805_v49 }
 0x303   : > { %v2840_v22 = vpop.f32.mrb[52].mxu1 }
 0x304   : > { %v1773_v29 = vadd.f32 %v2840_v22, %v4290_v47  ;;  %v1767_v44 = vpop.f32.mrb[53].mxu1 }
 0x305   : > { %v1768_v41 = vadd.f32 %v4290_v47, %v1767_v44  ;;  %v2202_v47 = vadd.s32 128, %v2201_v0 }
 0x306   : > { %v1807_v5 = vmax.f32 %v1773_v29, 0.0 }
 0x307   : > { %v1806_v4 = vmax.f32 %v1768_v41, 0.0  ;;  %v4367_v24 = vadd.s32 %v2204_v6, %v2202_v47 }
 0x309   : > { %2894 = vmatprep.mubr.msk.f32.mxu1 %vm1814_vm4, %v1806_v4  ;;  %vm2208_vm5 = vcmp.lt.s32.totalorder %v4367_v24, 300 }
 0x30a   : > { %2895 = vmatmul.mubr.msk.f32.gmra.mrb[84].mxu1 %vm1814_vm4, %v1807_v5 }
 0x30b   : > { %2639 = vmatprep.mubr.msk.f32.mxu1 %vm2208_vm5, %v3376_v20 }
 0x365   : > { %v2851_v11 = vpop.f32.mrb[54].mxu1 }
 0x366   : > { %v1983_v16 = vadd.f32 %v2851_v11, %v4364_v54  ;;  %v1977_v31 = vpop.f32.mrb[55].mxu1 }
 0x367   : > { %v1978_v17 = vadd.f32 %v4364_v54, %v1977_v31 }
 0x368   : > { %v4379_v10 = vmax.f32 %v1983_v16, 0.0 }
 0x369   : > { %v4384_v25 = vmax.f32 %v1978_v17, 0.0 }
 0x36a   : > { %2169 = vst.msk [vmem:[%s4375_s18 + $0x8] sm:$0xff] %vm1814_vm4, %v4379_v10  ;;  %v4391_v28 = vmul.f32 %v4379_v10, %v4379_v10 }
 0x36b   : > { %2168 = vst.msk [vmem:[%s4375_s18] sm:$0xff] %vm1814_vm4, %v4384_v25  ;;  %v3009_v40 = vpack.c.bf16 %v4379_v10, %v4384_v25  ;;  %v4400_v39 = vmul.f32 %v4384_v25, %v4384_v25 }
 0x36d   : > { %v2854_v50 = vpop.f32.mrb[56].mxu1  ;;  %v3041_v62 = vpack.c.bf16 %v4391_v28, %v4400_v39 }
 0x36e   : > { %v1993_v46 = vadd.f32 %v2854_v50, %v4364_v54  ;;  %v1987_v56 = vpop.f32.mrb[57].mxu1 }
 0x36f   : > { %v1988_v42 = vadd.f32 %v4364_v54, %v1987_v56 }
 0x370   : > { %v4406_v59 = vmax.f32 %v1993_v46, 0.0 }
 0x371   : > { %v4408_v60 = vmax.f32 %v1988_v42, 0.0 }
 0x372   : > { %2171 = vst.msk [vmem:[%s4375_s18 + $0x18] sm:$0xff] %vm1814_vm4, %v4406_v59  ;;  %v4415_v7 = vmul.f32 %v4406_v59, %v4406_v59 }
 0x373   : > { %2170 = vst.msk [vmem:[%s4375_s18 + $0x10] sm:$0xff] %vm1814_vm4, %v4408_v60  ;;  %v3013_v13 = vpack.c.bf16 %v4406_v59, %v4408_v60  ;;  %v4424_v14 = vmul.f32 %v4408_v60, %v4408_v60 }
 0x375   : > { %v2857_v43 = vpop.f32.mrb[58].mxu1  ;;  %v3045_v30 = vpack.c.bf16 %v4415_v7, %v4424_v14 }
 0x376   : > { %v2003_v55 = vadd.f32 %v2857_v43, %v4364_v54  ;;  %v1997_v15 = vpop.f32.mrb[59].mxu1 }
 0x377   : > { %v1998_v18 = vadd.f32 %v4364_v54, %v1997_v15 }
 0x378   : > { %v4430_v34 = vmax.f32 %v2003_v55, 0.0 }
 0x379   : > { %v4432_v12 = vmax.f32 %v1998_v18, 0.0 }
 0x37a   : > { %2173 = vst.msk [vmem:[%s4375_s18 + $0x28] sm:$0xff] %vm1814_vm4, %v4430_v34  ;;  %v4439_v32 = vmul.f32 %v4430_v34, %v4430_v34 }
 0x37b   : > { %2172 = vst.msk [vmem:[%s4375_s18 + $0x20] sm:$0xff] %vm1814_vm4, %v4432_v12  ;;  %v3017_v35 = vpack.c.bf16 %v4430_v34, %v4432_v12  ;;  %v4448_v36 = vmul.f32 %v4432_v12, %v4432_v12 }
 0x37d   : > { %v2860_v52 = vpop.f32.mrb[60].mxu1  ;;  %v3049_v63 = vpack.c.bf16 %v4439_v32, %v4448_v36 }
 0x37e   : > { %v2013_v61 = vadd.f32 %v2860_v52, %v4364_v54  ;;  %v2007_v45 = vpop.f32.mrb[61].mxu1 }
 0x37f   : > { %v2008_v57 = vadd.f32 %v4364_v54, %v2007_v45 }
 0x380   : > { %v4454_v58 = vmax.f32 %v2013_v61, 0.0 }
 0x381   : > { %v4456_v21 = vmax.f32 %v2008_v57, 0.0 }
 0x382   : > { %2175 = vst.msk [vmem:[%s4375_s18 + $0x38] sm:$0xff] %vm1814_vm4, %v4454_v58  ;;  %v4463_v19 = vmul.f32 %v4454_v58, %v4454_v58 }
 0x383   : > { %2174 = vst.msk [vmem:[%s4375_s18 + $0x30] sm:$0xff] %vm1814_vm4, %v4456_v21  ;;  %v3021_v27 = vpack.c.bf16 %v4454_v58, %v4456_v21  ;;  %v4472_v53 = vmul.f32 %v4456_v21, %v4456_v21 }
 0x385   : > { %v2863_v1 = vpop.f32.mrb[62].mxu1  ;;  %v3053_v3 = vpack.c.bf16 %v4463_v19, %v4472_v53 }
 0x386   : > { %v2023_v8 = vadd.f32 %v2863_v1, %v4364_v54  ;;  %v2017_v9 = vpop.f32.mrb[63].mxu1 }
 0x387   : > { %v2018_v23 = vadd.f32 %v4364_v54, %v2017_v9 }
 0x388   : > { %v4478_v26 = vmax.f32 %v2023_v8, 0.0 }
 0x389   : > { %v4480_v33 = vmax.f32 %v2018_v23, 0.0 }
 0x38a   : > { %2177 = vst.msk [vmem:[%s4375_s18 + $0x48] sm:$0xff] %vm1814_vm4, %v4478_v26  ;;  %v4487_v2 = vmul.f32 %v4478_v26, %v4478_v26 }
 0x38b   : > { %2176 = vst.msk [vmem:[%s4375_s18 + $0x40] sm:$0xff] %vm1814_vm4, %v4480_v33  ;;  %v3025_v37 = vpack.c.bf16 %v4478_v26, %v4480_v33  ;;  %v4496_v48 = vmul.f32 %v4480_v33, %v4480_v33 }
 0x38d   : > { %v2866_v49 = vpop.f32.mrb[64].mxu1  ;;  %v3057_v22 = vpack.c.bf16 %v4487_v2, %v4496_v48 }
 0x38e   : > { %v2033_v29 = vadd.f32 %v2866_v49, %v4364_v54  ;;  %v2027_v44 = vpop.f32.mrb[65].mxu1 }
 0x38f   : > { %v2028_v41 = vadd.f32 %v4364_v54, %v2027_v44 }
 0x390   : > { %v4502_v4 = vmax.f32 %v2033_v29, 0.0 }
 0x391   : > { %v4504_v5 = vmax.f32 %v2028_v41, 0.0 }
 0x392   : > { %2179 = vst.msk [vmem:[%s4375_s18 + $0x58] sm:$0xff] %vm1814_vm4, %v4502_v4  ;;  %v4511_v51 = vmul.f32 %v4502_v4, %v4502_v4 }
 0x393   : > { %2178 = vst.msk [vmem:[%s4375_s18 + $0x50] sm:$0xff] %vm1814_vm4, %v4504_v5  ;;  %v3029_v0 = vpack.c.bf16 %v4502_v4, %v4504_v5  ;;  %v4520_v47 = vmul.f32 %v4504_v5, %v4504_v5 }
 0x395   : > { %v2869_v6 = vpop.f32.mrb[66].mxu1  ;;  %v3061_v11 = vpack.c.bf16 %v4511_v51, %v4520_v47 }
 0x396   : > { %v2043_v16 = vadd.f32 %v2869_v6, %v4364_v54  ;;  %v2037_v31 = vpop.f32.mrb[67].mxu1 }
 0x397   : > { %v2038_v17 = vadd.f32 %v4364_v54, %v2037_v31 }
 0x398   : > { %v4526_v50 = vmax.f32 %v2043_v16, 0.0 }
 0x399   : > { %v4528_v46 = vmax.f32 %v2038_v17, 0.0 }
 0x39a   : > { %2181 = vst.msk [vmem:[%s4375_s18 + $0x68] sm:$0xff] %vm1814_vm4, %v4526_v50  ;;  %v4535_v56 = vmul.f32 %v4526_v50, %v4526_v50 }
 0x39b   : > { %2180 = vst.msk [vmem:[%s4375_s18 + $0x60] sm:$0xff] %vm1814_vm4, %v4528_v46  ;;  %v3033_v42 = vpack.c.bf16 %v4526_v50, %v4528_v46  ;;  %v4544_v43 = vmul.f32 %v4528_v46, %v4528_v46 }
 0x39d   : > { %v2872_v55 = vpop.f32.mrb[68].mxu1 }
 0x39e   : > { %v2053_v18 = vadd.f32 %v2872_v55, %v4364_v54  ;;  %v2047_v52 = vpop.f32.mrb[69].mxu1 }
 0x39f   : > { %v2048_v61 = vadd.f32 %v4364_v54, %v2047_v52 }
 0x3a0   : > { %v4550_v45 = vmax.f32 %v2053_v18, 0.0 }
 0x3a1   : > { %v4552_v57 = vmax.f32 %v2048_v61, 0.0 }
 0x3a2   : > { %2183 = vst.msk [vmem:[%s4375_s18 + $0x78] sm:$0xff] %vm1814_vm4, %v4550_v45  ;;  %v4559_v1 = vmul.f32 %v4550_v45, %v4550_v45 }
 0x3a3   : > { %2182 = vst.msk [vmem:[%s4375_s18 + $0x70] sm:$0xff] %vm1814_vm4, %v4552_v57  ;;  %v3037_v8 = vpack.c.bf16 %v4550_v45, %v4552_v57  ;;  %v4568_v9 = vmul.f32 %v4552_v57, %v4552_v57 }
 0x3a5   : > { %v2875_v23 = vpop.f32.mrb[70].mxu1  ;;  %v4790_v24 = vpack.c.bf16 %v4559_v1, %v4568_v9 }
 0x3a6   : > { %v2063_v29 = vadd.f32 %v2875_v23, %v4364_v54  ;;  %v2057_v44 = vpop.f32.mrb[71].mxu1 }
 0x3a7   : > { %v2058_v41 = vadd.f32 %v4364_v54, %v2057_v44 }
 0x3a8   : > { %v2153_v6 = vmax.f32 %v2063_v29, 0.0 }
 0x3a9   : > { %v2152_v16 = vmax.f32 %v2058_v41, 0.0 }
 0x3aa   : > { %2185 = vst.msk [vmem:[%s4375_s18 + $0x88] sm:$0xff] %vm1814_vm4, %v2153_v6  ;;  %v4576_v31 = vmul.f32 %v2153_v6, %v2153_v6 }
 0x3ab   : > { %2184 = vst.msk [vmem:[%s4375_s18 + $0x80] sm:$0xff] %vm1814_vm4, %v2152_v16  ;;  %v4580_v17 = vmul.f32 %v2152_v16, %v2152_v16  ;;  %v3007_v55 = vpack.c.bf16 %v2153_v6, %v2152_v16 }
 0x3ad   : > { %v2878_v18 = vpop.f32.mrb[72].mxu1  ;;  %3008 = vmatprep.subr.bf16.mxu1 %v3007_v55  ;;  %v3039_v52 = vpack.c.bf16 %v4576_v31, %v4580_v17 }
 0x3ae   : > { %v2073_v61 = vadd.f32 %v2878_v18, %v4364_v54  ;;  %v2067_v23 = vpop.f32.mrb[73].mxu1  ;;  %3010 = vmatpush3.bf16.msra.mxu1 %v3009_v40 }
 0x3af   : > { %v2068_v29 = vadd.f32 %v4364_v54, %v2067_v23 }
 0x3b0   : > { %v2155_v44 = vmax.f32 %v2073_v61, 0.0 }
 0x3b1   : > { %v2154_v41 = vmax.f32 %v2068_v29, 0.0 }
 0x3b2   : > { %2187 = vst.msk [vmem:[%s4375_s18 + $0x98] sm:$0xff] %vm1814_vm4, %v2155_v44  ;;  %v4591_v6 = vmul.f32 %v2155_v44, %v2155_v44 }
 0x3b3   : > { %2186 = vst.msk [vmem:[%s4375_s18 + $0x90] sm:$0xff] %vm1814_vm4, %v2154_v41  ;;  %v4595_v16 = vmul.f32 %v2154_v41, %v2154_v41  ;;  %v3011_v55 = vpack.c.bf16 %v2155_v44, %v2154_v41 }
 0x3b5   : > { %v2881_v18 = vpop.f32.mrb[74].mxu1  ;;  %3012 = vmatprep.subr.bf16.mxu1 %v3011_v55  ;;  %v3043_v10 = vpack.c.bf16 %v4591_v6, %v4595_v16 }
 0x3b6   : > { %v2083_v25 = vadd.f32 %v2881_v18, %v4364_v54  ;;  %v2077_v40 = vpop.f32.mrb[75].mxu1  ;;  %3014 = vmatpush3.bf16.msra.mxu1 %v3013_v13 }
 0x3b7   : > { %v2078_v61 = vadd.f32 %v4364_v54, %v2077_v40 }
 0x3b8   : > { %v2157_v23 = vmax.f32 %v2083_v25, 0.0 }
 0x3b9   : > { %v2156_v29 = vmax.f32 %v2078_v61, 0.0 }
 0x3ba   : > { %2189 = vst.msk [vmem:[%s4375_s18 + $0xa8] sm:$0xff] %vm1814_vm4, %v2157_v23  ;;  %v4606_v44 = vmul.f32 %v2157_v23, %v2157_v23 }
 0x3bb   : > { %2188 = vst.msk [vmem:[%s4375_s18 + $0xa0] sm:$0xff] %vm1814_vm4, %v2156_v29  ;;  %v4610_v41 = vmul.f32 %v2156_v29, %v2156_v29  ;;  %v3015_v55 = vpack.c.bf16 %v2157_v23, %v2156_v29 }
 0x3bd   : > { %v2884_v18 = vpop.f32.mrb[76].mxu1  ;;  %3016 = vmatprep.subr.bf16.mxu1 %v3015_v55  ;;  %v3047_v59 = vpack.c.bf16 %v4606_v44, %v4610_v41 }
 0x3be   : > { %v2093_v60 = vadd.f32 %v2884_v18, %v4364_v54  ;;  %v2087_v13 = vpop.f32.mrb[77].mxu1  ;;  %3018 = vmatpush3.bf16.msra.mxu1 %v3017_v35 }
 0x3bf   : > { %v2088_v25 = vadd.f32 %v4364_v54, %v2087_v13 }
 0x3c0   : > { %v2159_v40 = vmax.f32 %v2093_v60, 0.0 }
 0x3c1   : > { %v2158_v61 = vmax.f32 %v2088_v25, 0.0 }
 0x3c2   : > { %2191 = vst.msk [vmem:[%s4375_s18 + $0xb8] sm:$0xff] %vm1814_vm4, %v2159_v40  ;;  %v4621_v23 = vmul.f32 %v2159_v40, %v2159_v40 }
 0x3c3   : > { %2190 = vst.msk [vmem:[%s4375_s18 + $0xb0] sm:$0xff] %vm1814_vm4, %v2158_v61  ;;  %v4625_v29 = vmul.f32 %v2158_v61, %v2158_v61  ;;  %v3019_v55 = vpack.c.bf16 %v2159_v40, %v2158_v61 }
 0x3c5   : > { %v2887_v18 = vpop.f32.mrb[78].mxu1  ;;  %3020 = vmatprep.subr.bf16.mxu1 %v3019_v55  ;;  %v3051_v34 = vpack.c.bf16 %v4621_v23, %v4625_v29 }
 0x3c6   : > { %v2103_v12 = vadd.f32 %v2887_v18, %v4364_v54  ;;  %v2097_v35 = vpop.f32.mrb[79].mxu1  ;;  %3022 = vmatpush3.bf16.msra.mxu1 %v3021_v27 }
 0x3c7   : > { %v2098_v60 = vadd.f32 %v4364_v54, %v2097_v35 }
 0x3c8   : > { %v2161_v13 = vmax.f32 %v2103_v12, 0.0 }
 0x3c9   : > { %v2160_v25 = vmax.f32 %v2098_v60, 0.0 }
 0x3ca   : > { %2193 = vst.msk [vmem:[%s4375_s18 + $0xc8] sm:$0xff] %vm1814_vm4, %v2161_v13  ;;  %v2310_v40 = vmul.f32 %v2161_v13, %v2161_v13 }
 0x3cb   : > { %2192 = vst.msk [vmem:[%s4375_s18 + $0xc0] sm:$0xff] %vm1814_vm4, %v2160_v25  ;;  %v2309_v61 = vmul.f32 %v2160_v25, %v2160_v25  ;;  %v3023_v55 = vpack.c.bf16 %v2161_v13, %v2160_v25 }
 0x3cd   : > { %v2890_v49 = vpop.f32.mrb[80].mxu1  ;;  %3024 = vmatprep.subr.bf16.mxu1 %v3023_v55  ;;  %v3055_v18 = vpack.c.bf16 %v2310_v40, %v2309_v61 }
 0x3ce   : > { %v2113_v15 = vadd.f32 %v2890_v49, %v4364_v54  ;;  %v2107_v58 = vpop.f32.mrb[81].mxu1  ;;  %3026 = vmatpush3.bf16.msra.mxu1 %v3025_v37 }
 0x3cf   : > { %v2108_v21 = vadd.f32 %v4364_v54, %v2107_v58 }
 0x3d0   : > { %v2163_v27 = vmax.f32 %v2113_v15, 0.0 }
 0x3d1   : > { %v2162_v12 = vmax.f32 %v2108_v21, 0.0 }
 0x3d2   : > { %2195 = vst.msk [vmem:[%s4375_s18 + $0xd8] sm:$0xff] %vm1814_vm4, %v2163_v27  ;;  %v2312_v35 = vmul.f32 %v2163_v27, %v2163_v27 }
 0x3d3   : > { %2194 = vst.msk [vmem:[%s4375_s18 + $0xd0] sm:$0xff] %vm1814_vm4, %v2162_v12  ;;  %v2311_v60 = vmul.f32 %v2162_v12, %v2162_v12  ;;  %v3027_v13 = vpack.c.bf16 %v2163_v27, %v2162_v12 }
 0x3d5   : > { %v2893_v25 = vpop.f32.mrb[82].mxu1  ;;  %3028 = vmatprep.subr.bf16.mxu1 %v3027_v13  ;;  %v3059_v49 = vpack.c.bf16 %v2312_v35, %v2311_v60 }
 0x3d6   : > { %v2123_v40 = vadd.f32 %v2893_v25, %v4364_v54  ;;  %v2117_v26 = vpop.f32.mrb[83].mxu1  ;;  %3030 = vmatpush3.bf16.msra.mxu1 %v3029_v0 }
 0x3d7   : > { %v2118_v33 = vadd.f32 %v4364_v54, %v2117_v26 }
 0x3d8   : > { %v2165_v37 = vmax.f32 %v2123_v40, 0.0 }
 0x3d9   : > { %v2164_v15 = vmax.f32 %v2118_v33, 0.0 }
 0x3da   : > { %2197 = vst.msk [vmem:[%s4375_s18 + $0xe8] sm:$0xff] %vm1814_vm4, %v2165_v37  ;;  %v2314_v61 = vmul.f32 %v2165_v37, %v2165_v37 }
 0x3db   : > { %2196 = vst.msk [vmem:[%s4375_s18 + $0xe0] sm:$0xff] %vm1814_vm4, %v2164_v15  ;;  %v2313_v55 = vmul.f32 %v2164_v15, %v2164_v15  ;;  %v3031_v58 = vpack.c.bf16 %v2165_v37, %v2164_v15 }
 0x3dd   : > { %v2896_v21 = vpop.f32.mrb[84].mxu1  ;;  %3032 = vmatprep.subr.bf16.mxu1 %v3031_v58  ;;  %v3063_v27 = vpack.c.bf16 %v2314_v61, %v2313_v55 }
 0x3de   : > { %v2133_v12 = vadd.f32 %v2896_v21, %v4364_v54  ;;  %v2127_v4 = vpop.f32.mrb[85].mxu1  ;;  %3034 = vmatpush3.bf16.msra.mxu1 %v3033_v42 }
 0x3df   : > { %v2128_v5 = vadd.f32 %v4364_v54, %v2127_v4  ;;  %v4789_v54 = vpack.c.bf16 %v4535_v56, %v4544_v43 }
 0x3e0   : > { %v2167_v0 = vmax.f32 %v2133_v12, 0.0 }
 0x3e1   : > { %v2166_v35 = vmax.f32 %v2128_v5, 0.0 }
 0x3e2   : > { %2199 = vst.msk [vmem:[%s4375_s18 + $0xf8] sm:$0xff] %vm1814_vm4, %v2167_v0  ;;  %v2316_v60 = vmul.f32 %v2167_v0, %v2167_v0 }
 0x3e3   : > { %2198 = vst.msk [vmem:[%s4375_s18 + $0xf0] sm:$0xff] %vm1814_vm4, %v2166_v35  ;;  %v2315_v13 = vmul.f32 %v2166_v35, %v2166_v35  ;;  %v3035_v25 = vpack.c.bf16 %v2167_v0, %v2166_v35  ;;  %s3292_s18 = scalar_lea.vmem %s3291_s15, 64 }
 0x3e4   : > { %p3294_p2 = scmp.lt.s32.totalorder %s3292_s18, %s3286_s26 }
 0x3e5   : > { %3036 = vmatprep.subr.bf16.mxu1 %v3035_v25  ;;  %v3067_v40 = vpack.c.bf16 %v2316_v60, %v2315_v13 }
 0x3e6   : > { %3038 = vmatpush3.bf16.msra.mxu1 %v3037_v8  ;;  %p3295_p5 = por %p3294_p2, %p3293_p13 }
 0x3e7   : > { %3040 = vmatprep.subr.bf16.mxu1 %v3039_v52 }
 0x3e8   : > { %p3296_p4 = pnand %p3295_p5, %p3289_p6 }
 0x3e9   : > { %2640 = vmatmul.mubr.msk.f32.vlgmr.msra.gmra.mrb[86].mxu1 %vm2207_vm6, %v3376_v20 }
 0x3ea   : > { %3042 = vmatpush3.bf16.msra.mxu1 %v3041_v62  ;;  %2641 = vmatprep.mubr.msk.f32.mxu1 %vm2208_vm5, %v3376_v20 }
 0x3eb   : > { %3044 = vmatprep.subr.bf16.mxu1 %v3043_v10 }
 0x3ee   : > { %3046 = vmatpush3.bf16.msra.mxu1 %v3045_v30 }
 0x3ef   : > { %3048 = vmatprep.subr.bf16.mxu1 %v3047_v59 }
 0x3f2   : > { %3050 = vmatpush3.bf16.msra.mxu1 %v3049_v63 }
 0x3f3   : > { %3052 = vmatprep.subr.bf16.mxu1 %v3051_v34 }
 0x3f6   : > { %3054 = vmatpush3.bf16.msra.mxu1 %v3053_v3 }
 0x3f7   : > { %3056 = vmatprep.subr.bf16.mxu1 %v3055_v18 }
 0x3fa   : > { %3058 = vmatpush3.bf16.msra.mxu1 %v3057_v22 }
 0x3fb   : > { %3060 = vmatprep.subr.bf16.mxu1 %v3059_v49 }
 0x3fe   : > { %3062 = vmatpush3.bf16.msra.mxu1 %v3061_v11 }
 0x3ff   : > { %3064 = vmatprep.subr.bf16.mxu1 %v3063_v27 }
 0x402   : > { %3066 = vmatpush3.bf16.msra.mxu1 %v4789_v54 }
 0x403   : > { %3068 = vmatprep.subr.bf16.mxu1 %v3067_v40 }
 0x406   : > { %3070 = vmatpush3.bf16.msra.mxu1 %v4790_v24 }
 0x409   : > { %2642 = vmatmul.mubr.msk.f32.vlgmr.msra.gmra.mrb[88].mxu1 %vm2207_vm6, %v3376_v20 }
 0x4bc   : > { %v2751_v28 = vpop.f32.mrb[86].mxu1 }
 0x4bd   : > { %v2752_v39 = vpop.f32.mrb[87].mxu1 }
 0x4be   : > { %v2753_v62 = vadd.f32 %v2752_v39, %v2751_v28 }
 0x4c0   : > { %2284 = vst.msk [vmem:[%s375_s20] sm:$0x1] %vm2283_vm7, %v2753_v62 }
 0x4dc   : > { %v2786_v7 = vpop.f32.mrb[88].mxu1 }
 0x4dd   : > { %v2787_v14 = vpop.f32.mrb[89].mxu1 }
 0x4de   : > { %v2788_v30 = vadd.f32 %v2787_v14, %v2786_v7 }
 0x4e0   : > { %2387 = vst.msk [vmem:[%s375_s20 + $0x1] sm:$0x1] %vm2283_vm7, %v2788_v30 }
 0x4e1   : > { %3299 = shalt.err (!%p3296_p4)
}
 0x4e2   : > { %s3300_s16 = scalar_lea.hbm %s4719_s19, 32  ;;  %s3304_s20 = scalar_lea.hbm %s4777_s9, 64 }
 0x4e3   : > { %p3301_p7 = scmp.ne.s32.totalorder %s4719_s19, %s3300_s16  ;;  %p3305_p1 = scmp.lt.u32.totalorder %s4719_s19, %s4777_s9 }
 0x4e4   : > { %p3306_p3 = scmp.lt.u32.totalorder %s3304_s20, %s3300_s16  ;;  %p3308_p9 = scmp.lt.u32.totalorder %s3300_s16, %s4719_s19 }
 0x4e5   : > { %p3302_p10 = pnand %p3301_p7, %p4791_p11 }
 0x4e6   : > { %p3307_p8 = por %p3306_p3, %p3305_p1 }
 0x4e7   : > { %p3303_p12 = pneg %p3302_p10 }
 0x4e8   : > { %p3309_p0 = por %p3308_p9, %p3307_p8 }
 0x4ea   : > { %p3310_p6 = pnand %p3309_p0, %p3303_p12 }
 0x4ec   : > { %3313 = shalt.err (!%p3310_p6)
}
 0x4ed   : > { %3190 = dma.vmem_to_hbm [thread:$0]  (%p4791_p11), %s4721_s29, 32, %s4719_s19, %s2394_s25  }
 0x4ee PF: > { %s2431_s26 = sand.u32 1, %s3348_s30   ;;  %p4792_p13 = scmp.ne.s32.totalorder %s4784_s24, 0 }
 0x4ef   : > { %p4793_p2 = scmp.ge.s32.totalorder %s3368_s14, 2  ;;  %s2432_s17 = scalar_lea.sflag [#allocation5], %s2431_s26 }
 0x4f1   : > { %p3197_p5 = pnand %p4793_p2, %p4792_p13 }
 0x4f3   : > { %3343 = dma.done.wait (!%p3197_p5), %s2432_s17, 32  }
 0x4f4   : > { %3345 = vsyncadd (!%p3197_p5), %s2432_s17, 4294967264  ;;  %s26_s14 = sadd.s32 1, %s3368_s14   ;;  %s4794_s22 = sld [smem:[#allocation9_spill]] }
 0x4f5   : > { %p23_p4 = scmp.ge.s32.totalorder %s26_s14, 4   ;;  %s4795_s30 = smov %s3352_s10 }
 0x4f6   : > { %s4796_s10 = smov %s3356_s11  ;;  %s4797_s11 = smov %s3484_s23 }
 0x4f7   : > { %s4798_s12 = smov %s3364_s13  ;;  %25 = sbr.rel (!%p23_p4) target bundleno = 6 (0x6), region = 119 }
 0x4fa   : > { %s4799_s13 = smov %s4794_s22 }
 0x4fe   :  { %2437 = vsyncpa [#allocation4], 1 }
 0x4ff   :  { %2439 = vsyncpa [#allocation4 + $0x1], 1 }
 0x500   :  { %2440 = vsyncpa [#allocation5], 1 }
 0x501   :  { %2442 = vsyncpa [#allocation5 + $0x1], 1 }

</bundles_post_ra>
